<compile_context>
chip_gen: v7x
topology: tpu7x:2x2x1
jax: 0.10.0
libtpu: 0.0.40
codegen_flags: <defaults>
</compile_context>

<pallas_src>
import functools

import jax
import jax.numpy as jnp
from jax.experimental import pallas as pl
from jax.experimental.pallas import tpu as pltpu

LN_EPS = 1e-5   # torch.nn.LayerNorm default eps
PAD = 128       # lane width: pad every feature dimension to this

# Deterministic "genetic" traits (brain pattern_recognition=1.0 -> LeakyReLU(0.1)
# and compression_size == out_features).
GENETICS = dict(
    mind_memory_capacity=1.0,
    mind_pattern_recognition=1.0,
    mind_cognitive_growth_rate=0.5,
    mind_learning_efficiency=1.0,
    brain_pattern_recognition=1.0,
    brain_processing_speed=1.1,
    brain_neural_plasticity=1.0,
    brain_learning_rate=0.01,
)

LAYER_KEYS = ("w1", "b1", "g1", "be1", "wcx", "wcc", "bc", "gc", "bec",
              "wi1", "bi1", "wi2", "bi2", "gi", "bei")
MC_KEYS = ("wih", "whh", "bih", "bhh", "wg", "bg")


# ----------------------------- kernel helpers -----------------------------

def _masked_layernorm(x, gamma, beta, n_true):
    """LayerNorm over the first n_true lanes of a 128-lane-padded tensor.

    Pad lanes of `x` are guaranteed to be exactly zero (zero-padded weights /
    biases), so the sum over all lanes equals the sum over true lanes; only the
    squared deviations need explicit masking.  gamma/beta are zero in pad lanes
    so the output pad lanes stay exactly zero.
    """
    padded = x.shape[-1]
    inv_n = 1.0 / float(n_true)
    if n_true == padded:
        m = jnp.mean(x, axis=-1, keepdims=True)
        d = x - m
        v = jnp.mean(d * d, axis=-1, keepdims=True)
    else:
        mask = jax.lax.broadcasted_iota(jnp.int32, x.shape, x.ndim - 1) < n_true
        m = jnp.sum(x, axis=-1, keepdims=True) * inv_n
        d = jnp.where(mask, x - m, 0.0)
        v = jnp.sum(d * d, axis=-1, keepdims=True) * inv_n
    return d * jax.lax.rsqrt(v + LN_EPS) * gamma + beta


def _fused_forward_kernel(processing_speed, learning_efficiency, layer_dims,
                          *refs):
    """Entire NeuralAdaptiveNetwork forward in one kernel (all VMEM-resident).

    refs = [x, ctx, h0, c0,
            (15 refs per genetic layer) * len(layer_dims),
            (6 refs for the LSTM memory cell),
            wout, bout,
            out_ref, imp_ref]
    """
    it = iter(refs)
    x_ref, ctx_ref, h0_ref, c0_ref = next(it), next(it), next(it), next(it)
    layer_refs = [[next(it) for _ in LAYER_KEYS] for _ in layer_dims]
    mc_refs = [next(it) for _ in MC_KEYS]
    wout_ref, bout_ref = next(it), next(it)
    out_ref, imp_ref = next(it), next(it)

    x = x_ref[...]
    ctx = ctx_ref[...]              # (B, 1)
    P = x.shape[-1]                 # 128

    imp = None
    for (out_true, comp_true), lrefs in zip(layer_dims, layer_refs):
        (w1, b1, g1, be1, wcx, wcc, bc, gc, bec,
         wi1, bi1, wi2, bi2, gi, bei) = lrefs

        # Linear -> *processing_speed -> LayerNorm -> LeakyReLU(0.1)
        h = jnp.dot(x, w1[...], preferred_element_type=jnp.float32) + b1[...]
        h = h * processing_speed
        h = _masked_layernorm(h, g1[...], be1[...], out_true)
        h = jnp.where(h > 0, h, 0.1 * h)

        # compression gate: Linear(cat[h, ctx]) -> LN -> sigmoid
        #   cat([h, ctx]) @ Wc == h @ Wc[:out] + ctx * Wc[out:]   (K=1 -> VPU bcast)
        comp = (jnp.dot(h, wcx[...], preferred_element_type=jnp.float32)
                + ctx * wcc[...] + bc[...])
        comp = jax.nn.sigmoid(_masked_layernorm(comp, gc[...], bec[...], comp_true))

        # importance generator: Linear -> ReLU -> Linear -> LN -> sigmoid
        t = jnp.maximum(
            jnp.dot(comp, wi1[...], preferred_element_type=jnp.float32) + bi1[...],
            0.0)
        imp = jnp.dot(t, wi2[...], preferred_element_type=jnp.float32) + bi2[...]
        imp = jax.nn.sigmoid(_masked_layernorm(imp, gi[...], bei[...], out_true))

        x = h * imp

    # GeneticMemoryCell: LSTMCell (gates padded per-gate to 128 lanes each,
    # column order [i | f | g | o]) then sigmoid memory gate * efficiency.
    wih, whh, bih, bhh, wg, bg = mc_refs
    h0 = h0_ref[...]
    c0 = c0_ref[...]
    gates = (jnp.dot(x, wih[...], preferred_element_type=jnp.float32)
             + jnp.dot(h0, whh[...], preferred_element_type=jnp.float32)
             + bih[...] + bhh[...])                      # (B, 4*P)
    sig_if = jax.nn.sigmoid(gates[:, 0:2 * P])           # i|f in one EUP pass
    i_g = sig_if[:, 0:P]
    f_g = sig_if[:, P:2 * P]
    g_g = jnp.tanh(gates[:, 2 * P:3 * P])
    o_g = jax.nn.sigmoid(gates[:, 3 * P:4 * P])
    c_new = f_g * c0 + i_g * g_g
    h_new = o_g * jnp.tanh(c_new)
    mem_gate = jax.nn.sigmoid(
        jnp.dot(h_new, wg[...], preferred_element_type=jnp.float32) + bg[...])
    x = h_new * mem_gate * learning_efficiency

    # output Linear (lane-dense 128-wide slab; wrapper slices to output_size)
    out_ref[...] = (jnp.dot(x, wout_ref[...], preferred_element_type=jnp.float32)
                    + bout_ref[...])
    imp_ref[...] = imp


# ----------------------------- parameter setup -----------------------------

def init_params(key, input_size=32, output_size=32):
    g = GENETICS
    hidden = max(64, int(64 * g["mind_memory_capacity"]))               # 64
    num_layers = max(2, int(2 * g["mind_pattern_recognition"]))         # 2
    num_memory_cells = max(1, int(2 * g["mind_cognitive_growth_rate"])) # 1
    assert num_memory_cells == 1

    def w(key, shape, scale=0.1):
        return (scale * jax.random.normal(key, shape)).astype(jnp.float32)

    def pad2(a, rows, cols):
        return jnp.pad(a, ((0, rows - a.shape[0]), (0, cols - a.shape[1])))

    params = dict(layers=[], pad=PAD, output_size=output_size,
                  processing_speed=g["brain_processing_speed"],
                  learning_efficiency=g["mind_learning_efficiency"])

    cur = input_size
    for i in range(num_layers):
        out = int(hidden * (1 + 0.2 * (i - num_layers / 2)))   # 51, 64
        comp = int(out * g["brain_pattern_recognition"])       # == out
        ks = jax.random.split(key, 6)
        key = ks[0]
        lp = dict(
            out_true=out, comp_true=comp,
            w1=pad2(w(ks[1], (cur, out)), PAD, PAD),
            b1=jnp.zeros((1, PAD), jnp.float32),
            g1=pad2(jnp.ones((1, out), jnp.float32), 1, PAD),
            be1=jnp.zeros((1, PAD), jnp.float32),
            wcx=pad2(w(ks[2], (out, comp)), PAD, PAD),
            wcc=pad2(w(ks[3], (1, comp)), 1, PAD),
            bc=jnp.zeros((1, PAD), jnp.float32),
            gc=pad2(jnp.ones((1, comp), jnp.float32), 1, PAD),
            bec=jnp.zeros((1, PAD), jnp.float32),
            wi1=pad2(w(ks[4], (comp, out)), PAD, PAD),
            bi1=jnp.zeros((1, PAD), jnp.float32),
            wi2=pad2(w(ks[5], (out, out)), PAD, PAD),
            bi2=jnp.zeros((1, PAD), jnp.float32),
            gi=pad2(jnp.ones((1, out), jnp.float32), 1, PAD),
            bei=jnp.zeros((1, PAD), jnp.float32),
        )
        params["layers"].append(lp)
        cur = out

    lstm_size = int(hidden * g["mind_memory_capacity"])                 # 64
    ks = jax.random.split(key, 4)
    key = ks[0]
    wih_t = w(ks[1], (cur, 4 * lstm_size))        # transposed (in, 4*hidden)
    whh_t = w(ks[2], (lstm_size, 4 * lstm_size))

    def pad_gates(wm):
        # preserve PyTorch LSTMCell gate column order [i | f | g | o],
        # padding each 64-wide gate block to 128 lanes independently.
        chunks = [wm[:, k * lstm_size:(k + 1) * lstm_size] for k in range(4)]
        return jnp.concatenate([pad2(c, PAD, PAD) for c in chunks], axis=1)

    params["mc"] = dict(
        lstm_true=lstm_size,
        wih=pad_gates(wih_t),
        whh=pad_gates(whh_t),
        bih=jnp.zeros((1, 4 * PAD), jnp.float32),
        bhh=jnp.zeros((1, 4 * PAD), jnp.float32),
        wg=pad2(w(ks[3], (lstm_size, lstm_size)), PAD, PAD),
        bg=jnp.zeros((1, PAD), jnp.float32),
    )

    ks = jax.random.split(key, 2)
    params["wout"] = pad2(w(ks[1], (lstm_size, output_size)), PAD, PAD)
    params["bout"] = jnp.zeros((1, PAD), jnp.float32)
    return params


# ----------------------------- forward wrapper -----------------------------

def neural_adaptive_forward(params, x, context=None):
    batch = x.shape[0]
    P = params["pad"]
    if context is None:
        context = jnp.zeros((batch, 1), jnp.float32)

    x_p = jnp.pad(x.astype(jnp.float32), ((0, 0), (0, P - x.shape[1])))
    # reference resets h/c to zeros when the stored state batch (1) != batch
    h0 = jnp.zeros((batch, P), jnp.float32)
    c0 = jnp.zeros((batch, P), jnp.float32)

    layer_dims = tuple((lp["out_true"], lp["comp_true"]) for lp in params["layers"])

    args = [x_p, context, h0, c0]
    for lp in params["layers"]:
        args += [lp[k] for k in LAYER_KEYS]
    args += [params["mc"][k] for k in MC_KEYS]
    args += [params["wout"], params["bout"]]

    kernel = functools.partial(_fused_forward_kernel,
                               params["processing_speed"],
                               params["learning_efficiency"],
                               layer_dims)

    n_layers = len(params["layers"])
    flops = (n_layers * 4 * 2 * batch * P * P          # 4 matmuls / genetic layer
             + 2 * 2 * batch * P * (4 * P)             # LSTM wih + whh
             + 2 * batch * P * P                       # memory gate
             + 2 * batch * P * P)                      # output linear
    transcendentals = batch * P * (3 * n_layers + 6)
    bytes_accessed = 4 * (sum(int(a.size) for a in args) + 2 * batch * P)
    cost = pl.CostEstimate(flops=int(flops),
                           transcendentals=int(transcendentals),
                           bytes_accessed=int(bytes_accessed))

    vmem_spec = pl.BlockSpec(memory_space=pltpu.MemorySpace.VMEM)
    out_p, imp_p = pl.pallas_call(
        kernel,
        out_shape=(jax.ShapeDtypeStruct((batch, P), jnp.float32),
                   jax.ShapeDtypeStruct((batch, P), jnp.float32)),
        in_specs=[vmem_spec] * len(args),
        out_specs=(vmem_spec, vmem_spec),
        cost_estimate=cost,
    )(*args)

    out = out_p[:, :params["output_size"]]
    # TODO(synk): the reference does torch.stack(importance_signals).mean(0), but the
    # per-layer importance widths differ (51 vs 64) so that stack is invalid even in
    # PyTorch; we return the final layer's importance signal instead of faking it.
    mean_importance = imp_p[:, :params["layers"][-1]["out_true"]]
    return out, mean_importance


# ----------------------------------- main -----------------------------------

if __name__ == "__main__":
    key = jax.random.PRNGKey(0)
    pkey, xkey = jax.random.split(key)

    input_size, output_size, batch = 32, 32, 2
    params = init_params(pkey, input_size=input_size, output_size=output_size)
    x = jax.random.normal(xkey, (batch, input_size), dtype=jnp.float32)

    fwd = jax.jit(functools.partial(neural_adaptive_forward, params))
    out, importance = fwd(x)
    jax.block_until_ready((out, importance))

    assert out.shape == (batch, output_size), out.shape
    assert importance.shape == (batch, 64), importance.shape
    assert jnp.all(jnp.isfinite(out)) and jnp.all(jnp.isfinite(importance))
    print("KERNEL_OK")
</pallas_src>

<mosaic_0001>
module attributes {stable_mosaic.version = 11 : i64} {
  func.func @_fused_forward_kernel(%arg0: memref<2x128xf32, #tpu.memory_space<vmem>>, %arg1: memref<2x1xf32, #tpu.memory_space<vmem>>, %arg2: memref<2x128xf32, #tpu.memory_space<vmem>>, %arg3: memref<2x128xf32, #tpu.memory_space<vmem>>, %arg4: memref<128x128xf32, #tpu.memory_space<vmem>>, %arg5: memref<1x128xf32, #tpu.memory_space<vmem>>, %arg6: memref<1x128xf32, #tpu.memory_space<vmem>>, %arg7: memref<1x128xf32, #tpu.memory_space<vmem>>, %arg8: memref<128x128xf32, #tpu.memory_space<vmem>>, %arg9: memref<1x128xf32, #tpu.memory_space<vmem>>, %arg10: memref<1x128xf32, #tpu.memory_space<vmem>>, %arg11: memref<1x128xf32, #tpu.memory_space<vmem>>, %arg12: memref<1x128xf32, #tpu.memory_space<vmem>>, %arg13: memref<128x128xf32, #tpu.memory_space<vmem>>, %arg14: memref<1x128xf32, #tpu.memory_space<vmem>>, %arg15: memref<128x128xf32, #tpu.memory_space<vmem>>, %arg16: memref<1x128xf32, #tpu.memory_space<vmem>>, %arg17: memref<1x128xf32, #tpu.memory_space<vmem>>, %arg18: memref<1x128xf32, #tpu.memory_space<vmem>>, %arg19: memref<128x128xf32, #tpu.memory_space<vmem>>, %arg20: memref<1x128xf32, #tpu.memory_space<vmem>>, %arg21: memref<1x128xf32, #tpu.memory_space<vmem>>, %arg22: memref<1x128xf32, #tpu.memory_space<vmem>>, %arg23: memref<128x128xf32, #tpu.memory_space<vmem>>, %arg24: memref<1x128xf32, #tpu.memory_space<vmem>>, %arg25: memref<1x128xf32, #tpu.memory_space<vmem>>, %arg26: memref<1x128xf32, #tpu.memory_space<vmem>>, %arg27: memref<1x128xf32, #tpu.memory_space<vmem>>, %arg28: memref<128x128xf32, #tpu.memory_space<vmem>>, %arg29: memref<1x128xf32, #tpu.memory_space<vmem>>, %arg30: memref<128x128xf32, #tpu.memory_space<vmem>>, %arg31: memref<1x128xf32, #tpu.memory_space<vmem>>, %arg32: memref<1x128xf32, #tpu.memory_space<vmem>>, %arg33: memref<1x128xf32, #tpu.memory_space<vmem>>, %arg34: memref<128x512xf32, #tpu.memory_space<vmem>>, %arg35: memref<128x512xf32, #tpu.memory_space<vmem>>, %arg36: memref<1x512xf32, #tpu.memory_space<vmem>>, %arg37: memref<1x512xf32, #tpu.memory_space<vmem>>, %arg38: memref<128x128xf32, #tpu.memory_space<vmem>>, %arg39: memref<1x128xf32, #tpu.memory_space<vmem>>, %arg40: memref<128x128xf32, #tpu.memory_space<vmem>>, %arg41: memref<1x128xf32, #tpu.memory_space<vmem>>, %arg42: memref<2x128xf32, #tpu.memory_space<vmem>>, %arg43: memref<2x128xf32, #tpu.memory_space<vmem>>) attributes {dimension_semantics = [], scalar_prefetch = 0 : i64, scratch_operands = 0 : i64, tpu.core_type = #tpu.core_type<tc>} {
    %c0 = arith.constant 0 : index
    %c0_0 = arith.constant 0 : index
    %0 = vector.load %arg0[%c0, %c0_0] : memref<2x128xf32, #tpu.memory_space<vmem>>, vector<2x128xf32>
    %c0_1 = arith.constant 0 : index
    %c0_2 = arith.constant 0 : index
    %1 = vector.load %arg1[%c0_1, %c0_2] : memref<2x1xf32, #tpu.memory_space<vmem>>, vector<2x1xf32>
    %c0_3 = arith.constant 0 : index
    %c0_4 = arith.constant 0 : index
    %2 = vector.load %arg4[%c0_3, %c0_4] : memref<128x128xf32, #tpu.memory_space<vmem>>, vector<128x128xf32>
    %cst = arith.constant dense<0.000000e+00> : vector<2x128xf32>
    %3 = tpu.matmul %0, %2, %cst {dimension_numbers = #tpu.dot_dimension_numbers<[1], [0], [0], [1], [0, 0, 1, 1], [], []>} : vector<2x128xf32>, vector<128x128xf32>, vector<2x128xf32> -> vector<2x128xf32>
    %c0_5 = arith.constant 0 : index
    %c0_6 = arith.constant 0 : index
    %4 = vector.load %arg5[%c0_5, %c0_6] : memref<1x128xf32, #tpu.memory_space<vmem>>, vector<1x128xf32>
    %5 = vector.broadcast %4 : vector<1x128xf32> to vector<2x128xf32>
    %6 = arith.addf %3, %5 : vector<2x128xf32>
    %cst_7 = arith.constant 1.100000e+00 : f32
    %7 = vector.broadcast %cst_7 : f32 to vector<2x128xf32>
    %8 = arith.mulf %6, %7 : vector<2x128xf32>
    %c0_8 = arith.constant 0 : index
    %c0_9 = arith.constant 0 : index
    %9 = vector.load %arg6[%c0_8, %c0_9] : memref<1x128xf32, #tpu.memory_space<vmem>>, vector<1x128xf32>
    %c0_10 = arith.constant 0 : index
    %c0_11 = arith.constant 0 : index
    %10 = vector.load %arg7[%c0_10, %c0_11] : memref<1x128xf32, #tpu.memory_space<vmem>>, vector<1x128xf32>
    %11 = tpu.iota {dimensions = array<i32: 1>} : vector<2x128xi32>
    %c51_i32 = arith.constant 51 : i32
    %12 = vector.broadcast %c51_i32 : i32 to vector<2x128xi32>
    %13 = arith.cmpi slt, %11, %12 : vector<2x128xi32>
    %cst_12 = arith.constant dense<0.000000e+00> : vector<2xf32>
    %14 = vector.multi_reduction <add>, %8, %cst_12 [1] : vector<2x128xf32> to vector<2xf32>
    %15 = vector.shape_cast %14 : vector<2xf32> to vector<2x1xf32>
    %cst_13 = arith.constant 0.0196078438 : f32
    %16 = vector.broadcast %cst_13 : f32 to vector<2x1xf32>
    %17 = arith.mulf %15, %16 : vector<2x1xf32>
    %18 = vector.broadcast %17 : vector<2x1xf32> to vector<2x128xf32>
    %19 = arith.subf %8, %18 : vector<2x128xf32>
    %cst_14 = arith.constant 0.000000e+00 : f32
    %20 = vector.broadcast %cst_14 : f32 to vector<2x128xf32>
    %21 = arith.select %13, %19, %20 : vector<2x128xi1>, vector<2x128xf32>
    %22 = arith.mulf %21, %21 : vector<2x128xf32>
    %cst_15 = arith.constant dense<0.000000e+00> : vector<2xf32>
    %23 = vector.multi_reduction <add>, %22, %cst_15 [1] : vector<2x128xf32> to vector<2xf32>
    %24 = vector.shape_cast %23 : vector<2xf32> to vector<2x1xf32>
    %cst_16 = arith.constant 0.0196078438 : f32
    %25 = vector.broadcast %cst_16 : f32 to vector<2x1xf32>
    %26 = arith.mulf %24, %25 : vector<2x1xf32>
    %cst_17 = arith.constant 9.99999974E-6 : f32
    %27 = vector.broadcast %cst_17 : f32 to vector<2x1xf32>
    %28 = arith.addf %26, %27 : vector<2x1xf32>
    %29 = math.rsqrt %28 : vector<2x1xf32>
    %30 = vector.broadcast %29 : vector<2x1xf32> to vector<2x128xf32>
    %31 = arith.mulf %21, %30 : vector<2x128xf32>
    %32 = vector.broadcast %9 : vector<1x128xf32> to vector<2x128xf32>
    %33 = arith.mulf %31, %32 : vector<2x128xf32>
    %34 = vector.broadcast %10 : vector<1x128xf32> to vector<2x128xf32>
    %35 = arith.addf %33, %34 : vector<2x128xf32>
    %cst_18 = arith.constant 0.000000e+00 : f32
    %36 = vector.broadcast %cst_18 : f32 to vector<2x128xf32>
    %37 = arith.cmpf ogt, %35, %36 : vector<2x128xf32>
    %cst_19 = arith.constant 1.000000e-01 : f32
    %38 = vector.broadcast %cst_19 : f32 to vector<2x128xf32>
    %39 = arith.mulf %38, %35 : vector<2x128xf32>
    %40 = arith.select %37, %35, %39 : vector<2x128xi1>, vector<2x128xf32>
    %c0_20 = arith.constant 0 : index
    %c0_21 = arith.constant 0 : index
    %41 = vector.load %arg8[%c0_20, %c0_21] : memref<128x128xf32, #tpu.memory_space<vmem>>, vector<128x128xf32>
    %cst_22 = arith.constant dense<0.000000e+00> : vector<2x128xf32>
    %42 = tpu.matmul %40, %41, %cst_22 {dimension_numbers = #tpu.dot_dimension_numbers<[1], [0], [0], [1], [0, 0, 1, 1], [], []>} : vector<2x128xf32>, vector<128x128xf32>, vector<2x128xf32> -> vector<2x128xf32>
    %c0_23 = arith.constant 0 : index
    %c0_24 = arith.constant 0 : index
    %43 = vector.load %arg9[%c0_23, %c0_24] : memref<1x128xf32, #tpu.memory_space<vmem>>, vector<1x128xf32>
    %44 = vector.broadcast %1 : vector<2x1xf32> to vector<2x128xf32>
    %45 = vector.broadcast %43 : vector<1x128xf32> to vector<2x128xf32>
    %46 = arith.mulf %44, %45 : vector<2x128xf32>
    %47 = arith.addf %42, %46 : vector<2x128xf32>
    %c0_25 = arith.constant 0 : index
    %c0_26 = arith.constant 0 : index
    %48 = vector.load %arg10[%c0_25, %c0_26] : memref<1x128xf32, #tpu.memory_space<vmem>>, vector<1x128xf32>
    %49 = vector.broadcast %48 : vector<1x128xf32> to vector<2x128xf32>
    %50 = arith.addf %47, %49 : vector<2x128xf32>
    %c0_27 = arith.constant 0 : index
    %c0_28 = arith.constant 0 : index
    %51 = vector.load %arg11[%c0_27, %c0_28] : memref<1x128xf32, #tpu.memory_space<vmem>>, vector<1x128xf32>
    %c0_29 = arith.constant 0 : index
    %c0_30 = arith.constant 0 : index
    %52 = vector.load %arg12[%c0_29, %c0_30] : memref<1x128xf32, #tpu.memory_space<vmem>>, vector<1x128xf32>
    %53 = tpu.iota {dimensions = array<i32: 1>} : vector<2x128xi32>
    %c51_i32_31 = arith.constant 51 : i32
    %54 = vector.broadcast %c51_i32_31 : i32 to vector<2x128xi32>
    %55 = arith.cmpi slt, %53, %54 : vector<2x128xi32>
    %cst_32 = arith.constant dense<0.000000e+00> : vector<2xf32>
    %56 = vector.multi_reduction <add>, %50, %cst_32 [1] : vector<2x128xf32> to vector<2xf32>
    %57 = vector.shape_cast %56 : vector<2xf32> to vector<2x1xf32>
    %cst_33 = arith.constant 0.0196078438 : f32
    %58 = vector.broadcast %cst_33 : f32 to vector<2x1xf32>
    %59 = arith.mulf %57, %58 : vector<2x1xf32>
    %60 = vector.broadcast %59 : vector<2x1xf32> to vector<2x128xf32>
    %61 = arith.subf %50, %60 : vector<2x128xf32>
    %cst_34 = arith.constant 0.000000e+00 : f32
    %62 = vector.broadcast %cst_34 : f32 to vector<2x128xf32>
    %63 = arith.select %55, %61, %62 : vector<2x128xi1>, vector<2x128xf32>
    %64 = arith.mulf %63, %63 : vector<2x128xf32>
    %cst_35 = arith.constant dense<0.000000e+00> : vector<2xf32>
    %65 = vector.multi_reduction <add>, %64, %cst_35 [1] : vector<2x128xf32> to vector<2xf32>
    %66 = vector.shape_cast %65 : vector<2xf32> to vector<2x1xf32>
    %cst_36 = arith.constant 0.0196078438 : f32
    %67 = vector.broadcast %cst_36 : f32 to vector<2x1xf32>
    %68 = arith.mulf %66, %67 : vector<2x1xf32>
    %cst_37 = arith.constant 9.99999974E-6 : f32
    %69 = vector.broadcast %cst_37 : f32 to vector<2x1xf32>
    %70 = arith.addf %68, %69 : vector<2x1xf32>
    %71 = math.rsqrt %70 : vector<2x1xf32>
    %72 = vector.broadcast %71 : vector<2x1xf32> to vector<2x128xf32>
    %73 = arith.mulf %63, %72 : vector<2x128xf32>
    %74 = vector.broadcast %51 : vector<1x128xf32> to vector<2x128xf32>
    %75 = arith.mulf %73, %74 : vector<2x128xf32>
    %76 = vector.broadcast %52 : vector<1x128xf32> to vector<2x128xf32>
    %77 = arith.addf %75, %76 : vector<2x128xf32>
    %78 = arith.negf %77 : vector<2x128xf32>
    %79 = math.exp %78 : vector<2x128xf32>
    %cst_38 = arith.constant 1.000000e+00 : f32
    %80 = vector.broadcast %cst_38 : f32 to vector<2x128xf32>
    %81 = arith.addf %80, %79 : vector<2x128xf32>
    %82 = arith.divf %80, %81 : vector<2x128xf32>
    %c0_39 = arith.constant 0 : index
    %c0_40 = arith.constant 0 : index
    %83 = vector.load %arg13[%c0_39, %c0_40] : memref<128x128xf32, #tpu.memory_space<vmem>>, vector<128x128xf32>
    %cst_41 = arith.constant dense<0.000000e+00> : vector<2x128xf32>
    %84 = tpu.matmul %82, %83, %cst_41 {dimension_numbers = #tpu.dot_dimension_numbers<[1], [0], [0], [1], [0, 0, 1, 1], [], []>} : vector<2x128xf32>, vector<128x128xf32>, vector<2x128xf32> -> vector<2x128xf32>
    %c0_42 = arith.constant 0 : index
    %c0_43 = arith.constant 0 : index
    %85 = vector.load %arg14[%c0_42, %c0_43] : memref<1x128xf32, #tpu.memory_space<vmem>>, vector<1x128xf32>
    %86 = vector.broadcast %85 : vector<1x128xf32> to vector<2x128xf32>
    %87 = arith.addf %84, %86 : vector<2x128xf32>
    %cst_44 = arith.constant 0.000000e+00 : f32
    %88 = vector.broadcast %cst_44 : f32 to vector<2x128xf32>
    %89 = arith.maximumf %87, %88 : vector<2x128xf32>
    %c0_45 = arith.constant 0 : index
    %c0_46 = arith.constant 0 : index
    %90 = vector.load %arg15[%c0_45, %c0_46] : memref<128x128xf32, #tpu.memory_space<vmem>>, vector<128x128xf32>
    %cst_47 = arith.constant dense<0.000000e+00> : vector<2x128xf32>
    %91 = tpu.matmul %89, %90, %cst_47 {dimension_numbers = #tpu.dot_dimension_numbers<[1], [0], [0], [1], [0, 0, 1, 1], [], []>} : vector<2x128xf32>, vector<128x128xf32>, vector<2x128xf32> -> vector<2x128xf32>
    %c0_48 = arith.constant 0 : index
    %c0_49 = arith.constant 0 : index
    %92 = vector.load %arg16[%c0_48, %c0_49] : memref<1x128xf32, #tpu.memory_space<vmem>>, vector<1x128xf32>
    %93 = vector.broadcast %92 : vector<1x128xf32> to vector<2x128xf32>
    %94 = arith.addf %91, %93 : vector<2x128xf32>
    %c0_50 = arith.constant 0 : index
    %c0_51 = arith.constant 0 : index
    %95 = vector.load %arg17[%c0_50, %c0_51] : memref<1x128xf32, #tpu.memory_space<vmem>>, vector<1x128xf32>
    %c0_52 = arith.constant 0 : index
    %c0_53 = arith.constant 0 : index
    %96 = vector.load %arg18[%c0_52, %c0_53] : memref<1x128xf32, #tpu.memory_space<vmem>>, vector<1x128xf32>
    %97 = tpu.iota {dimensions = array<i32: 1>} : vector<2x128xi32>
    %c51_i32_54 = arith.constant 51 : i32
    %98 = vector.broadcast %c51_i32_54 : i32 to vector<2x128xi32>
    %99 = arith.cmpi slt, %97, %98 : vector<2x128xi32>
    %cst_55 = arith.constant dense<0.000000e+00> : vector<2xf32>
    %100 = vector.multi_reduction <add>, %94, %cst_55 [1] : vector<2x128xf32> to vector<2xf32>
    %101 = vector.shape_cast %100 : vector<2xf32> to vector<2x1xf32>
    %cst_56 = arith.constant 0.0196078438 : f32
    %102 = vector.broadcast %cst_56 : f32 to vector<2x1xf32>
    %103 = arith.mulf %101, %102 : vector<2x1xf32>
    %104 = vector.broadcast %103 : vector<2x1xf32> to vector<2x128xf32>
    %105 = arith.subf %94, %104 : vector<2x128xf32>
    %cst_57 = arith.constant 0.000000e+00 : f32
    %106 = vector.broadcast %cst_57 : f32 to vector<2x128xf32>
    %107 = arith.select %99, %105, %106 : vector<2x128xi1>, vector<2x128xf32>
    %108 = arith.mulf %107, %107 : vector<2x128xf32>
    %cst_58 = arith.constant dense<0.000000e+00> : vector<2xf32>
    %109 = vector.multi_reduction <add>, %108, %cst_58 [1] : vector<2x128xf32> to vector<2xf32>
    %110 = vector.shape_cast %109 : vector<2xf32> to vector<2x1xf32>
    %cst_59 = arith.constant 0.0196078438 : f32
    %111 = vector.broadcast %cst_59 : f32 to vector<2x1xf32>
    %112 = arith.mulf %110, %111 : vector<2x1xf32>
    %cst_60 = arith.constant 9.99999974E-6 : f32
    %113 = vector.broadcast %cst_60 : f32 to vector<2x1xf32>
    %114 = arith.addf %112, %113 : vector<2x1xf32>
    %115 = math.rsqrt %114 : vector<2x1xf32>
    %116 = vector.broadcast %115 : vector<2x1xf32> to vector<2x128xf32>
    %117 = arith.mulf %107, %116 : vector<2x128xf32>
    %118 = vector.broadcast %95 : vector<1x128xf32> to vector<2x128xf32>
    %119 = arith.mulf %117, %118 : vector<2x128xf32>
    %120 = vector.broadcast %96 : vector<1x128xf32> to vector<2x128xf32>
    %121 = arith.addf %119, %120 : vector<2x128xf32>
    %122 = arith.negf %121 : vector<2x128xf32>
    %123 = math.exp %122 : vector<2x128xf32>
    %cst_61 = arith.constant 1.000000e+00 : f32
    %124 = vector.broadcast %cst_61 : f32 to vector<2x128xf32>
    %125 = arith.addf %124, %123 : vector<2x128xf32>
    %126 = arith.divf %124, %125 : vector<2x128xf32>
    %127 = arith.mulf %40, %126 : vector<2x128xf32>
    %c0_62 = arith.constant 0 : index
    %c0_63 = arith.constant 0 : index
    %128 = vector.load %arg19[%c0_62, %c0_63] : memref<128x128xf32, #tpu.memory_space<vmem>>, vector<128x128xf32>
    %cst_64 = arith.constant dense<0.000000e+00> : vector<2x128xf32>
    %129 = tpu.matmul %127, %128, %cst_64 {dimension_numbers = #tpu.dot_dimension_numbers<[1], [0], [0], [1], [0, 0, 1, 1], [], []>} : vector<2x128xf32>, vector<128x128xf32>, vector<2x128xf32> -> vector<2x128xf32>
    %c0_65 = arith.constant 0 : index
    %c0_66 = arith.constant 0 : index
    %130 = vector.load %arg20[%c0_65, %c0_66] : memref<1x128xf32, #tpu.memory_space<vmem>>, vector<1x128xf32>
    %131 = vector.broadcast %130 : vector<1x128xf32> to vector<2x128xf32>
    %132 = arith.addf %129, %131 : vector<2x128xf32>
    %cst_67 = arith.constant 1.100000e+00 : f32
    %133 = vector.broadcast %cst_67 : f32 to vector<2x128xf32>
    %134 = arith.mulf %132, %133 : vector<2x128xf32>
    %c0_68 = arith.constant 0 : index
    %c0_69 = arith.constant 0 : index
    %135 = vector.load %arg21[%c0_68, %c0_69] : memref<1x128xf32, #tpu.memory_space<vmem>>, vector<1x128xf32>
    %c0_70 = arith.constant 0 : index
    %c0_71 = arith.constant 0 : index
    %136 = vector.load %arg22[%c0_70, %c0_71] : memref<1x128xf32, #tpu.memory_space<vmem>>, vector<1x128xf32>
    %137 = tpu.iota {dimensions = array<i32: 1>} : vector<2x128xi32>
    %c64_i32 = arith.constant 64 : i32
    %138 = vector.broadcast %c64_i32 : i32 to vector<2x128xi32>
    %139 = arith.cmpi slt, %137, %138 : vector<2x128xi32>
    %cst_72 = arith.constant dense<0.000000e+00> : vector<2xf32>
    %140 = vector.multi_reduction <add>, %134, %cst_72 [1] : vector<2x128xf32> to vector<2xf32>
    %141 = vector.shape_cast %140 : vector<2xf32> to vector<2x1xf32>
    %cst_73 = arith.constant 1.562500e-02 : f32
    %142 = vector.broadcast %cst_73 : f32 to vector<2x1xf32>
    %143 = arith.mulf %141, %142 : vector<2x1xf32>
    %144 = vector.broadcast %143 : vector<2x1xf32> to vector<2x128xf32>
    %145 = arith.subf %134, %144 : vector<2x128xf32>
    %cst_74 = arith.constant 0.000000e+00 : f32
    %146 = vector.broadcast %cst_74 : f32 to vector<2x128xf32>
    %147 = arith.select %139, %145, %146 : vector<2x128xi1>, vector<2x128xf32>
    %148 = arith.mulf %147, %147 : vector<2x128xf32>
    %cst_75 = arith.constant dense<0.000000e+00> : vector<2xf32>
    %149 = vector.multi_reduction <add>, %148, %cst_75 [1] : vector<2x128xf32> to vector<2xf32>
    %150 = vector.shape_cast %149 : vector<2xf32> to vector<2x1xf32>
    %cst_76 = arith.constant 1.562500e-02 : f32
    %151 = vector.broadcast %cst_76 : f32 to vector<2x1xf32>
    %152 = arith.mulf %150, %151 : vector<2x1xf32>
    %cst_77 = arith.constant 9.99999974E-6 : f32
    %153 = vector.broadcast %cst_77 : f32 to vector<2x1xf32>
    %154 = arith.addf %152, %153 : vector<2x1xf32>
    %155 = math.rsqrt %154 : vector<2x1xf32>
    %156 = vector.broadcast %155 : vector<2x1xf32> to vector<2x128xf32>
    %157 = arith.mulf %147, %156 : vector<2x128xf32>
    %158 = vector.broadcast %135 : vector<1x128xf32> to vector<2x128xf32>
    %159 = arith.mulf %157, %158 : vector<2x128xf32>
    %160 = vector.broadcast %136 : vector<1x128xf32> to vector<2x128xf32>
    %161 = arith.addf %159, %160 : vector<2x128xf32>
    %cst_78 = arith.constant 0.000000e+00 : f32
    %162 = vector.broadcast %cst_78 : f32 to vector<2x128xf32>
    %163 = arith.cmpf ogt, %161, %162 : vector<2x128xf32>
    %cst_79 = arith.constant 1.000000e-01 : f32
    %164 = vector.broadcast %cst_79 : f32 to vector<2x128xf32>
    %165 = arith.mulf %164, %161 : vector<2x128xf32>
    %166 = arith.select %163, %161, %165 : vector<2x128xi1>, vector<2x128xf32>
    %c0_80 = arith.constant 0 : index
    %c0_81 = arith.constant 0 : index
    %167 = vector.load %arg23[%c0_80, %c0_81] : memref<128x128xf32, #tpu.memory_space<vmem>>, vector<128x128xf32>
    %cst_82 = arith.constant dense<0.000000e+00> : vector<2x128xf32>
    %168 = tpu.matmul %166, %167, %cst_82 {dimension_numbers = #tpu.dot_dimension_numbers<[1], [0], [0], [1], [0, 0, 1, 1], [], []>} : vector<2x128xf32>, vector<128x128xf32>, vector<2x128xf32> -> vector<2x128xf32>
    %c0_83 = arith.constant 0 : index
    %c0_84 = arith.constant 0 : index
    %169 = vector.load %arg24[%c0_83, %c0_84] : memref<1x128xf32, #tpu.memory_space<vmem>>, vector<1x128xf32>
    %170 = vector.broadcast %1 : vector<2x1xf32> to vector<2x128xf32>
    %171 = vector.broadcast %169 : vector<1x128xf32> to vector<2x128xf32>
    %172 = arith.mulf %170, %171 : vector<2x128xf32>
    %173 = arith.addf %168, %172 : vector<2x128xf32>
    %c0_85 = arith.constant 0 : index
    %c0_86 = arith.constant 0 : index
    %174 = vector.load %arg25[%c0_85, %c0_86] : memref<1x128xf32, #tpu.memory_space<vmem>>, vector<1x128xf32>
    %175 = vector.broadcast %174 : vector<1x128xf32> to vector<2x128xf32>
    %176 = arith.addf %173, %175 : vector<2x128xf32>
    %c0_87 = arith.constant 0 : index
    %c0_88 = arith.constant 0 : index
    %177 = vector.load %arg26[%c0_87, %c0_88] : memref<1x128xf32, #tpu.memory_space<vmem>>, vector<1x128xf32>
    %c0_89 = arith.constant 0 : index
    %c0_90 = arith.constant 0 : index
    %178 = vector.load %arg27[%c0_89, %c0_90] : memref<1x128xf32, #tpu.memory_space<vmem>>, vector<1x128xf32>
    %179 = tpu.iota {dimensions = array<i32: 1>} : vector<2x128xi32>
    %c64_i32_91 = arith.constant 64 : i32
    %180 = vector.broadcast %c64_i32_91 : i32 to vector<2x128xi32>
    %181 = arith.cmpi slt, %179, %180 : vector<2x128xi32>
    %cst_92 = arith.constant dense<0.000000e+00> : vector<2xf32>
    %182 = vector.multi_reduction <add>, %176, %cst_92 [1] : vector<2x128xf32> to vector<2xf32>
    %183 = vector.shape_cast %182 : vector<2xf32> to vector<2x1xf32>
    %cst_93 = arith.constant 1.562500e-02 : f32
    %184 = vector.broadcast %cst_93 : f32 to vector<2x1xf32>
    %185 = arith.mulf %183, %184 : vector<2x1xf32>
    %186 = vector.broadcast %185 : vector<2x1xf32> to vector<2x128xf32>
    %187 = arith.subf %176, %186 : vector<2x128xf32>
    %cst_94 = arith.constant 0.000000e+00 : f32
    %188 = vector.broadcast %cst_94 : f32 to vector<2x128xf32>
    %189 = arith.select %181, %187, %188 : vector<2x128xi1>, vector<2x128xf32>
    %190 = arith.mulf %189, %189 : vector<2x128xf32>
    %cst_95 = arith.constant dense<0.000000e+00> : vector<2xf32>
    %191 = vector.multi_reduction <add>, %190, %cst_95 [1] : vector<2x128xf32> to vector<2xf32>
    %192 = vector.shape_cast %191 : vector<2xf32> to vector<2x1xf32>
    %cst_96 = arith.constant 1.562500e-02 : f32
    %193 = vector.broadcast %cst_96 : f32 to vector<2x1xf32>
    %194 = arith.mulf %192, %193 : vector<2x1xf32>
    %cst_97 = arith.constant 9.99999974E-6 : f32
    %195 = vector.broadcast %cst_97 : f32 to vector<2x1xf32>
    %196 = arith.addf %194, %195 : vector<2x1xf32>
    %197 = math.rsqrt %196 : vector<2x1xf32>
    %198 = vector.broadcast %197 : vector<2x1xf32> to vector<2x128xf32>
    %199 = arith.mulf %189, %198 : vector<2x128xf32>
    %200 = vector.broadcast %177 : vector<1x128xf32> to vector<2x128xf32>
    %201 = arith.mulf %199, %200 : vector<2x128xf32>
    %202 = vector.broadcast %178 : vector<1x128xf32> to vector<2x128xf32>
    %203 = arith.addf %201, %202 : vector<2x128xf32>
    %204 = arith.negf %203 : vector<2x128xf32>
    %205 = math.exp %204 : vector<2x128xf32>
    %cst_98 = arith.constant 1.000000e+00 : f32
    %206 = vector.broadcast %cst_98 : f32 to vector<2x128xf32>
    %207 = arith.addf %206, %205 : vector<2x128xf32>
    %208 = arith.divf %206, %207 : vector<2x128xf32>
    %c0_99 = arith.constant 0 : index
    %c0_100 = arith.constant 0 : index
    %209 = vector.load %arg28[%c0_99, %c0_100] : memref<128x128xf32, #tpu.memory_space<vmem>>, vector<128x128xf32>
    %cst_101 = arith.constant dense<0.000000e+00> : vector<2x128xf32>
    %210 = tpu.matmul %208, %209, %cst_101 {dimension_numbers = #tpu.dot_dimension_numbers<[1], [0], [0], [1], [0, 0, 1, 1], [], []>} : vector<2x128xf32>, vector<128x128xf32>, vector<2x128xf32> -> vector<2x128xf32>
    %c0_102 = arith.constant 0 : index
    %c0_103 = arith.constant 0 : index
    %211 = vector.load %arg29[%c0_102, %c0_103] : memref<1x128xf32, #tpu.memory_space<vmem>>, vector<1x128xf32>
    %212 = vector.broadcast %211 : vector<1x128xf32> to vector<2x128xf32>
    %213 = arith.addf %210, %212 : vector<2x128xf32>
    %cst_104 = arith.constant 0.000000e+00 : f32
    %214 = vector.broadcast %cst_104 : f32 to vector<2x128xf32>
    %215 = arith.maximumf %213, %214 : vector<2x128xf32>
    %c0_105 = arith.constant 0 : index
    %c0_106 = arith.constant 0 : index
    %216 = vector.load %arg30[%c0_105, %c0_106] : memref<128x128xf32, #tpu.memory_space<vmem>>, vector<128x128xf32>
    %cst_107 = arith.constant dense<0.000000e+00> : vector<2x128xf32>
    %217 = tpu.matmul %215, %216, %cst_107 {dimension_numbers = #tpu.dot_dimension_numbers<[1], [0], [0], [1], [0, 0, 1, 1], [], []>} : vector<2x128xf32>, vector<128x128xf32>, vector<2x128xf32> -> vector<2x128xf32>
    %c0_108 = arith.constant 0 : index
    %c0_109 = arith.constant 0 : index
    %218 = vector.load %arg31[%c0_108, %c0_109] : memref<1x128xf32, #tpu.memory_space<vmem>>, vector<1x128xf32>
    %219 = vector.broadcast %218 : vector<1x128xf32> to vector<2x128xf32>
    %220 = arith.addf %217, %219 : vector<2x128xf32>
    %c0_110 = arith.constant 0 : index
    %c0_111 = arith.constant 0 : index
    %221 = vector.load %arg32[%c0_110, %c0_111] : memref<1x128xf32, #tpu.memory_space<vmem>>, vector<1x128xf32>
    %c0_112 = arith.constant 0 : index
    %c0_113 = arith.constant 0 : index
    %222 = vector.load %arg33[%c0_112, %c0_113] : memref<1x128xf32, #tpu.memory_space<vmem>>, vector<1x128xf32>
    %223 = tpu.iota {dimensions = array<i32: 1>} : vector<2x128xi32>
    %c64_i32_114 = arith.constant 64 : i32
    %224 = vector.broadcast %c64_i32_114 : i32 to vector<2x128xi32>
    %225 = arith.cmpi slt, %223, %224 : vector<2x128xi32>
    %cst_115 = arith.constant dense<0.000000e+00> : vector<2xf32>
    %226 = vector.multi_reduction <add>, %220, %cst_115 [1] : vector<2x128xf32> to vector<2xf32>
    %227 = vector.shape_cast %226 : vector<2xf32> to vector<2x1xf32>
    %cst_116 = arith.constant 1.562500e-02 : f32
    %228 = vector.broadcast %cst_116 : f32 to vector<2x1xf32>
    %229 = arith.mulf %227, %228 : vector<2x1xf32>
    %230 = vector.broadcast %229 : vector<2x1xf32> to vector<2x128xf32>
    %231 = arith.subf %220, %230 : vector<2x128xf32>
    %cst_117 = arith.constant 0.000000e+00 : f32
    %232 = vector.broadcast %cst_117 : f32 to vector<2x128xf32>
    %233 = arith.select %225, %231, %232 : vector<2x128xi1>, vector<2x128xf32>
    %234 = arith.mulf %233, %233 : vector<2x128xf32>
    %cst_118 = arith.constant dense<0.000000e+00> : vector<2xf32>
    %235 = vector.multi_reduction <add>, %234, %cst_118 [1] : vector<2x128xf32> to vector<2xf32>
    %236 = vector.shape_cast %235 : vector<2xf32> to vector<2x1xf32>
    %cst_119 = arith.constant 1.562500e-02 : f32
    %237 = vector.broadcast %cst_119 : f32 to vector<2x1xf32>
    %238 = arith.mulf %236, %237 : vector<2x1xf32>
    %cst_120 = arith.constant 9.99999974E-6 : f32
    %239 = vector.broadcast %cst_120 : f32 to vector<2x1xf32>
    %240 = arith.addf %238, %239 : vector<2x1xf32>
    %241 = math.rsqrt %240 : vector<2x1xf32>
    %242 = vector.broadcast %241 : vector<2x1xf32> to vector<2x128xf32>
    %243 = arith.mulf %233, %242 : vector<2x128xf32>
    %244 = vector.broadcast %221 : vector<1x128xf32> to vector<2x128xf32>
    %245 = arith.mulf %243, %244 : vector<2x128xf32>
    %246 = vector.broadcast %222 : vector<1x128xf32> to vector<2x128xf32>
    %247 = arith.addf %245, %246 : vector<2x128xf32>
    %248 = arith.negf %247 : vector<2x128xf32>
    %249 = math.exp %248 : vector<2x128xf32>
    %cst_121 = arith.constant 1.000000e+00 : f32
    %250 = vector.broadcast %cst_121 : f32 to vector<2x128xf32>
    %251 = arith.addf %250, %249 : vector<2x128xf32>
    %252 = arith.divf %250, %251 : vector<2x128xf32>
    %253 = arith.mulf %166, %252 : vector<2x128xf32>
    %c0_122 = arith.constant 0 : index
    %c0_123 = arith.constant 0 : index
    %254 = vector.load %arg2[%c0_122, %c0_123] : memref<2x128xf32, #tpu.memory_space<vmem>>, vector<2x128xf32>
    %c0_124 = arith.constant 0 : index
    %c0_125 = arith.constant 0 : index
    %255 = vector.load %arg3[%c0_124, %c0_125] : memref<2x128xf32, #tpu.memory_space<vmem>>, vector<2x128xf32>
    %c0_126 = arith.constant 0 : index
    %c0_127 = arith.constant 0 : index
    %256 = vector.load %arg34[%c0_126, %c0_127] : memref<128x512xf32, #tpu.memory_space<vmem>>, vector<128x512xf32>
    %cst_128 = arith.constant dense<0.000000e+00> : vector<2x512xf32>
    %257 = tpu.matmul %253, %256, %cst_128 {dimension_numbers = #tpu.dot_dimension_numbers<[1], [0], [0], [1], [0, 0, 1, 1], [], []>} : vector<2x128xf32>, vector<128x512xf32>, vector<2x512xf32> -> vector<2x512xf32>
    %c0_129 = arith.constant 0 : index
    %c0_130 = arith.constant 0 : index
    %258 = vector.load %arg35[%c0_129, %c0_130] : memref<128x512xf32, #tpu.memory_space<vmem>>, vector<128x512xf32>
    %cst_131 = arith.constant dense<0.000000e+00> : vector<2x512xf32>
    %259 = tpu.matmul %254, %258, %cst_131 {dimension_numbers = #tpu.dot_dimension_numbers<[1], [0], [0], [1], [0, 0, 1, 1], [], []>} : vector<2x128xf32>, vector<128x512xf32>, vector<2x512xf32> -> vector<2x512xf32>
    %260 = arith.addf %257, %259 : vector<2x512xf32>
    %c0_132 = arith.constant 0 : index
    %c0_133 = arith.constant 0 : index
    %261 = vector.load %arg36[%c0_132, %c0_133] : memref<1x512xf32, #tpu.memory_space<vmem>>, vector<1x512xf32>
    %262 = vector.broadcast %261 : vector<1x512xf32> to vector<2x512xf32>
    %263 = arith.addf %260, %262 : vector<2x512xf32>
    %c0_134 = arith.constant 0 : index
    %c0_135 = arith.constant 0 : index
    %264 = vector.load %arg37[%c0_134, %c0_135] : memref<1x512xf32, #tpu.memory_space<vmem>>, vector<1x512xf32>
    %265 = vector.broadcast %264 : vector<1x512xf32> to vector<2x512xf32>
    %266 = arith.addf %263, %265 : vector<2x512xf32>
    %267 = vector.extract_strided_slice %266 {offsets = [0, 0], sizes = [2, 256], strides = [1, 1]} : vector<2x512xf32> to vector<2x256xf32>
    %268 = arith.negf %267 : vector<2x256xf32>
    %269 = math.exp %268 : vector<2x256xf32>
    %cst_136 = arith.constant 1.000000e+00 : f32
    %270 = vector.broadcast %cst_136 : f32 to vector<2x256xf32>
    %271 = arith.addf %270, %269 : vector<2x256xf32>
    %272 = arith.divf %270, %271 : vector<2x256xf32>
    %273 = vector.extract_strided_slice %272 {offsets = [0, 0], sizes = [2, 128], strides = [1, 1]} : vector<2x256xf32> to vector<2x128xf32>
    %274 = vector.extract_strided_slice %272 {offsets = [0, 128], sizes = [2, 128], strides = [1, 1]} : vector<2x256xf32> to vector<2x128xf32>
    %275 = vector.extract_strided_slice %266 {offsets = [0, 256], sizes = [2, 128], strides = [1, 1]} : vector<2x512xf32> to vector<2x128xf32>
    %276 = math.tanh %275 : vector<2x128xf32>
    %277 = vector.extract_strided_slice %266 {offsets = [0, 384], sizes = [2, 128], strides = [1, 1]} : vector<2x512xf32> to vector<2x128xf32>
    %278 = arith.negf %277 : vector<2x128xf32>
    %279 = math.exp %278 : vector<2x128xf32>
    %cst_137 = arith.constant 1.000000e+00 : f32
    %280 = vector.broadcast %cst_137 : f32 to vector<2x128xf32>
    %281 = arith.addf %280, %279 : vector<2x128xf32>
    %282 = arith.divf %280, %281 : vector<2x128xf32>
    %283 = arith.mulf %274, %255 : vector<2x128xf32>
    %284 = arith.mulf %273, %276 : vector<2x128xf32>
    %285 = arith.addf %283, %284 : vector<2x128xf32>
    %286 = math.tanh %285 : vector<2x128xf32>
    %287 = arith.mulf %282, %286 : vector<2x128xf32>
    %c0_138 = arith.constant 0 : index
    %c0_139 = arith.constant 0 : index
    %288 = vector.load %arg38[%c0_138, %c0_139] : memref<128x128xf32, #tpu.memory_space<vmem>>, vector<128x128xf32>
    %cst_140 = arith.constant dense<0.000000e+00> : vector<2x128xf32>
    %289 = tpu.matmul %287, %288, %cst_140 {dimension_numbers = #tpu.dot_dimension_numbers<[1], [0], [0], [1], [0, 0, 1, 1], [], []>} : vector<2x128xf32>, vector<128x128xf32>, vector<2x128xf32> -> vector<2x128xf32>
    %c0_141 = arith.constant 0 : index
    %c0_142 = arith.constant 0 : index
    %290 = vector.load %arg39[%c0_141, %c0_142] : memref<1x128xf32, #tpu.memory_space<vmem>>, vector<1x128xf32>
    %291 = vector.broadcast %290 : vector<1x128xf32> to vector<2x128xf32>
    %292 = arith.addf %289, %291 : vector<2x128xf32>
    %293 = arith.negf %292 : vector<2x128xf32>
    %294 = math.exp %293 : vector<2x128xf32>
    %cst_143 = arith.constant 1.000000e+00 : f32
    %295 = vector.broadcast %cst_143 : f32 to vector<2x128xf32>
    %296 = arith.addf %295, %294 : vector<2x128xf32>
    %297 = arith.divf %295, %296 : vector<2x128xf32>
    %298 = arith.mulf %287, %297 : vector<2x128xf32>
    %cst_144 = arith.constant 1.000000e+00 : f32
    %299 = vector.broadcast %cst_144 : f32 to vector<2x128xf32>
    %300 = arith.mulf %298, %299 : vector<2x128xf32>
    %c0_145 = arith.constant 0 : index
    %c0_146 = arith.constant 0 : index
    %301 = vector.load %arg40[%c0_145, %c0_146] : memref<128x128xf32, #tpu.memory_space<vmem>>, vector<128x128xf32>
    %cst_147 = arith.constant dense<0.000000e+00> : vector<2x128xf32>
    %302 = tpu.matmul %300, %301, %cst_147 {dimension_numbers = #tpu.dot_dimension_numbers<[1], [0], [0], [1], [0, 0, 1, 1], [], []>} : vector<2x128xf32>, vector<128x128xf32>, vector<2x128xf32> -> vector<2x128xf32>
    %c0_148 = arith.constant 0 : index
    %c0_149 = arith.constant 0 : index
    %303 = vector.load %arg41[%c0_148, %c0_149] : memref<1x128xf32, #tpu.memory_space<vmem>>, vector<1x128xf32>
    %304 = vector.broadcast %303 : vector<1x128xf32> to vector<2x128xf32>
    %305 = arith.addf %302, %304 : vector<2x128xf32>
    %c0_150 = arith.constant 0 : index
    %c0_151 = arith.constant 0 : index
    %306 = vector.load %arg42[%c0_150, %c0_151] : memref<2x128xf32, #tpu.memory_space<vmem>>, vector<2x128xf32>
    tpu.vector_store %arg42[%c0_150, %c0_151], %305 {strides = array<i32>} : memref<2x128xf32, #tpu.memory_space<vmem>>, vector<2x128xf32>,
    %c0_152 = arith.constant 0 : index
    %c0_153 = arith.constant 0 : index
    %307 = vector.load %arg43[%c0_152, %c0_153] : memref<2x128xf32, #tpu.memory_space<vmem>>, vector<2x128xf32>
    tpu.vector_store %arg43[%c0_152, %c0_153], %252 {strides = array<i32>} : memref<2x128xf32, #tpu.memory_space<vmem>>, vector<2x128xf32>,
    return
  }
}

</mosaic_0001>

<bundles_post_ra>
// kernel: neural_adaptive_forward.1
= control target key start
LH: loop header
LB: loop body
LE: loop exit
PB: predicated region body
PF: predicated region fallthrough
CT: control target
= control target key end

     0   :  { %s3460_s6 = smov 1   ;;  %s3461_s10 = smov 2   ;;  %s4079_s0 = inlined_call_operand.smem [shape: u32[44], index: -1, kind: input, shape index: {}] }
   0x1   :  { %s3533_s5 = sld [smem:[%s4079_s0]]   ;;  %s3462_s14 = smov 3  }
   0x2   :  { %s3538_s9 = sld [smem:[%s4079_s0 + %s3460_s6]]   ;;  %s3463_s18 = smov 4  }
   0x3   :  { %s3543_s13 = sld [smem:[%s4079_s0 + %s3461_s10]]   ;;  %s3464_s22 = smov 5  }
   0x4   :  { %s3548_s17 = sld [smem:[%s4079_s0 + %s3462_s14]]   ;;  %s3465_s26 = smov 6  }
   0x5   :  { %s3553_s21 = sld [smem:[%s4079_s0 + %s3463_s18]]   ;;  %s3466_s30 = smov 7  }
   0x6   :  { %s3558_s25 = sld [smem:[%s4079_s0 + %s3464_s22]]   ;;  %s3467_s4 = smov 8  }
   0x7   :  { %s3563_s29 = sld [smem:[%s4079_s0 + %s3465_s26]]   ;;  %s3468_s10 = smov 9  }
   0x8   :  { %s3568_s3 = sld [smem:[%s4079_s0 + %s3466_s30]]   ;;  %s3469_s15 = smov 10  }
   0x9   :  { %4080 = sst [smem:[#allocation34_spill]] %s3543_s13  ;;  %s3470_s20 = smov 11  }
   0xa   :  { %4081 = sst [smem:[#allocation35_spill]] %s3548_s17  ;;  %s3471_s26 = smov 12  }
   0xb   :  { %s3573_s8 = sld [smem:[%s4079_s0 + %s3467_s4]]   ;;  %s3472_s1 = smov 13  }
   0xc   :  { %s3578_s14 = sld [smem:[%s4079_s0 + %s3468_s10]]   ;;  %s3473_s7 = smov 14  }
   0xd   :  { %4082 = sst [smem:[#allocation36_spill]] %s3563_s29  ;;  %s3475_s22 = smov 16  }
   0xe   :  { %4083 = sst [smem:[#allocation37_spill]] %s3568_s3  ;;  %s3476_s28 = smov 17  }
   0xf   :  { %s3583_s19 = sld [smem:[%s4079_s0 + %s3469_s15]]   ;;  %s3474_s15 = smov 15  }
  0x10   :  { %s3588_s24 = sld [smem:[%s4079_s0 + %s3470_s20]]  }
  0x11   :  { %s3593_s30 = sld [smem:[%s4079_s0 + %s3471_s26]]  }
  0x12   :  { %4084 = sst [smem:[#allocation38_spill]] %s3578_s14 }
  0x13   :  { %s3598_s6 = sld [smem:[%s4079_s0 + %s3472_s1]]  }
  0x14   :  { %s3603_s12 = sld [smem:[%s4079_s0 + %s3473_s7]]   ;;  %s3477_s7 = smov 18  }
  0x15   :  { %4085 = sst [smem:[#allocation39_spill]] %s3583_s19 }
  0x16   :  { %4086 = sst [smem:[#allocation40_spill]] %s3588_s24 }
  0x17   :  { %4087 = sst [smem:[#allocation41_spill]] %s3593_s30 }
  0x18   :  { %s3608_s20 = sld [smem:[%s4079_s0 + %s3474_s15]]   ;;  %s3478_s15 = smov 19  }
  0x19   :  { %s3613_s27 = sld [smem:[%s4079_s0 + %s3475_s22]]   ;;  %s3479_s22 = smov 20  }
  0x1a   :  { %4088 = sst [smem:[#allocation42_spill]] %s3603_s12 }
  0x1b   :  { %s3618_s4 = sld [smem:[%s4079_s0 + %s3476_s28]]   ;;  %s3480_s28 = smov 21  }
  0x1c   :  { %s3623_s17 = sld [smem:[%s4079_s0 + %s3477_s7]]   ;;  %s3481_s7 = smov 22  }
  0x1d   :  { %s3628_s13 = sld [smem:[%s4079_s0 + %s3478_s15]]   ;;  %s3482_s15 = smov 23  }
  0x1e   :  { %s3648_s12 = sld [smem:[%s4079_s0 + %s3482_s15]]   ;;  %s3486_s15 = smov 27  }
  0x1f   :  { %4089 = sst [smem:[#allocation43_spill]] %s3613_s27 }
  0x20   :  { %s3633_s27 = sld [smem:[%s4079_s0 + %s3479_s22]]   ;;  %s3483_s22 = smov 24  }
  0x21   :  { %4090 = sst [smem:[#allocation44_spill]] %s3618_s4 }
  0x22   :  { %4091 = sst [smem:[#allocation45_spill]] %s3623_s17 }
  0x23   :  { %s3638_s4 = sld [smem:[%s4079_s0 + %s3480_s28]]   ;;  %s3484_s28 = smov 25  }
  0x24   :  { %s3643_s17 = sld [smem:[%s4079_s0 + %s3481_s7]]   ;;  %s3485_s7 = smov 26  }
  0x25   :  { %s3668_s30 = sld [smem:[%s4079_s0 + %s3486_s15]]   ;;  %s3490_s15 = smov 31  }
  0x26   :  { %4092 = sst [smem:[#allocation46_spill]] %s3633_s27 }
  0x27   :  { %s3653_s27 = sld [smem:[%s4079_s0 + %s3483_s22]]   ;;  %s3487_s22 = smov 28  }
  0x29   :  { %4093 = sst [smem:[#allocation47_spill]] %s3638_s4 }
  0x2a   :  { %4094 = sst [smem:[#allocation48_spill]] %s3643_s17 }
  0x2b   :  { %s3658_s4 = sld [smem:[%s4079_s0 + %s3484_s28]]   ;;  %s3488_s28 = smov 29  }
  0x2c   :  { %s3663_s17 = sld [smem:[%s4079_s0 + %s3485_s7]]   ;;  %s3489_s7 = smov 30  }
  0x2d   :  { %4095 = sst [smem:[#allocation49_spill]] %s3653_s27 }
  0x2e   :  { %4098 = sst [smem:[#allocation52_spill]] %s3668_s30 }
  0x2f   :  { %s3673_s27 = sld [smem:[%s4079_s0 + %s3487_s22]]   ;;  %s3491_s22 = smov 32  }
  0x30   :  { %s3688_s30 = sld [smem:[%s4079_s0 + %s3490_s15]]   ;;  %s3494_s15 = smov 35  }
  0x31   :  { %4096 = sst [smem:[#allocation50_spill]] %s3658_s4 }
  0x32   :  { %4097 = sst [smem:[#allocation51_spill]] %s3663_s17 }
  0x33   :  { %s3678_s4 = sld [smem:[%s4079_s0 + %s3488_s28]]   ;;  %s3492_s28 = smov 33  }
  0x34   :  { %s3683_s17 = sld [smem:[%s4079_s0 + %s3489_s7]]   ;;  %s3493_s7 = smov 34  }
  0x35   :  { %s3693_s24 = sld [smem:[%s4079_s0 + %s3491_s22]]   ;;  %s3495_s22 = smov 36  }
  0x36   :  { %4100 = sst [smem:[#allocation54_spill]] %s3688_s30 }
  0x37   :  { %s3703_s19 = sld [smem:[%s4079_s0 + %s3493_s7]]   ;;  %s3497_s7 = smov 38  }
  0x38   :  { %s3708_s30 = sld [smem:[%s4079_s0 + %s3494_s15]]   ;;  %s3498_s15 = smov 39  }
  0x39   :  { %4099 = sst [smem:[#allocation53_spill]] %s3678_s4 }
  0x3a   :  { %s3698_s4 = sld [smem:[%s4079_s0 + %s3492_s28]]   ;;  %s3496_s28 = smov 37  }
  0x3b   :  { %4101 = sst [smem:[#allocation55_spill]] %s3693_s24 }
  0x3c   :  { %s3713_s24 = sld [smem:[%s4079_s0 + %s3495_s22]]   ;;  %s3499_s22 = smov 40  }
  0x3d   :  { %s3723_s14 = sld [smem:[%s4079_s0 + %s3497_s7]]   ;;  %s3501_s7 = smov 42  }
  0x3e   :  { %s3728_s3 = sld [smem:[%s4079_s0 + %s3498_s15]]   ;;  %s3502_s15 = smov 43  }
  0x3f   :  { %s3743_s29 = sld [smem:[%s4079_s0 + %s3501_s7]]  }
  0x40   :  { %4102 = sst [smem:[#allocation56_spill]] %s3698_s4 }
  0x41   :  { %s3718_s4 = sld [smem:[%s4079_s0 + %s3496_s28]]   ;;  %s3500_s28 = smov 41  }
  0x42   :  { %4103 = sst [smem:[#allocation57_spill]] %s3713_s24 }
  0x43   :  { %s3733_s24 = sld [smem:[%s4079_s0 + %s3499_s22]]  }
  0x44   :  { %4105 = sst [smem:[#allocation59_spill]] %s3728_s3 }
  0x45   :  { %s3748_s3 = sld [smem:[%s4079_s0 + %s3502_s15]]  }
  0x47   :  { %4104 = sst [smem:[#allocation58_spill]] %s3718_s4 }
  0x48   :  { %s3738_s4 = sld [smem:[%s4079_s0 + %s3500_s28]]  }
  0x49   :  { %93 = vsyncpa [#allocation3], 0 }
  0x4a   :  { %94 = vsyncpa [#allocation6], 0 }
  0x4b   :  { %95 = vsyncpa [#allocation9], 0 }
  0x4c   :  { %96 = vsyncpa [#allocation12], 0 }
  0x4d   :  { %97 = vsyncpa [#allocation15], 0 }
  0x4e   :  { %98 = vsyncpa [#allocation18], 0 }
  0x4f   :  { %99 = vsyncpa [#allocation21], 0 }
  0x50   :  { %100 = vsyncpa [#allocation4], 0 }
  0x51   :  { %101 = vsyncpa [#allocation24], 0  ;;  %s3503_s22 = smov [#allocation5]   ;;  %s3504_s26 = smov [#allocation8]  }
  0x52   :  { %s133_s23 = sshll.u32 %s3503_s22, 4  ;;  %s167_s28 = sshll.u32 %s3504_s26, 4  ;;  %s134_s23 = int_to_ptr.vmem [resolvable:$true] %s133_s23  ;;  %s3750_s28 = int_to_ptr.vmem [resolvable:$true] %s167_s28 }
  0x53   :  { %s3134_s0 = scalar_lea.hbm %s3573_s8, 2048 }
  0x54   :  { %p3135_p0 = scmp.ne.s32.totalorder %s3573_s8, %s3134_s0  ;;  %p3138_p1 = scmp.lt.u32.totalorder %s3134_s0, %s3573_s8 }
  0x56   :  { %p3140_p2 = pnand %p3138_p1, %p3135_p0 }
  0x58   :  { %3143 = shalt.err (!%p3140_p2)
}
  0x59   :  { %s3144_s1 = scalar_lea.vmem %s134_s23, 2048  ;;  %p3149_p4 = scmp.lt.s32.totalorder %s134_s23, %s134_s23 }
  0x5a   :  { %p3145_p3 = scmp.ne.s32.totalorder %s134_s23, %s3144_s1  ;;  %p3150_p5 = scmp.lt.s32.totalorder %s3144_s1, %s3144_s1 }
  0x5c   :  { %p3151_p6 = por %p3150_p5, %p3149_p4 }
  0x5e   :  { %p3152_p7 = pnand %p3151_p6, %p3145_p3 }
  0x60   :  { %3155 = shalt.err (!%p3152_p7)
}
  0x61   :  { %s3505_s2 = smov 128   ;;  %s3506_s7 = smov 8  }
  0x62   :  { %139 = dma.hbm_to_vmem [thread:$0]  %s3573_s8, 2048, %s134_s23, [#allocation6], %s3505_s2, %s3505_s2, %s3506_s7  }
  0x63   :  { %s3156_s10 = scalar_lea.hbm %s3608_s20, 2048 }
  0x64   :  { %p3157_p8 = scmp.ne.s32.totalorder %s3608_s20, %s3156_s10  ;;  %p3160_p9 = scmp.lt.u32.totalorder %s3156_s10, %s3608_s20 }
  0x66   :  { %p3162_p10 = pnand %p3160_p9, %p3157_p8 }
  0x68   :  { %3165 = shalt.err (!%p3162_p10)
}
  0x69   :  { %s3166_s11 = scalar_lea.vmem %s3750_s28, 2048  ;;  %p3171_p12 = scmp.lt.s32.totalorder %s3750_s28, %s3750_s28 }
  0x6a   :  { %p3167_p11 = scmp.ne.s32.totalorder %s3750_s28, %s3166_s11  ;;  %p3172_p13 = scmp.lt.s32.totalorder %s3166_s11, %s3166_s11 }
  0x6c   :  { %p3173_p0 = por %p3172_p13, %p3171_p12 }
  0x6e   :  { %p3174_p1 = pnand %p3173_p0, %p3167_p11 }
  0x70   :  { %3177 = shalt.err (!%p3174_p1)
}
  0x71   :  { %173 = dma.hbm_to_vmem [thread:$0]  %s3608_s20, 2048, %s3750_s28, [#allocation9], %s3505_s2, %s3505_s2, %s3506_s7  }
  0x72   :  { %s3507_s8 = smov [#allocation11]   ;;  %s3508_s16 = smov [#allocation14]  }
  0x73   :  { %s203_s15 = sshll.u32 %s3507_s8, 4  ;;  %s237_s18 = sshll.u32 %s3508_s16, 4  ;;  %s204_s15 = int_to_ptr.vmem [resolvable:$true] %s203_s15  ;;  %s3771_s18 = int_to_ptr.vmem [resolvable:$true] %s237_s18 }
  0x74   :  { %s3178_s22 = scalar_lea.hbm %s3648_s12, 2048 }
  0x75   :  { %p3179_p2 = scmp.ne.s32.totalorder %s3648_s12, %s3178_s22  ;;  %p3182_p3 = scmp.lt.u32.totalorder %s3178_s22, %s3648_s12 }
  0x77   :  { %p3184_p4 = pnand %p3182_p3, %p3179_p2 }
  0x79   :  { %3187 = shalt.err (!%p3184_p4)
}
  0x7a   :  { %s3188_s23 = scalar_lea.vmem %s204_s15, 2048  ;;  %p3193_p6 = scmp.lt.s32.totalorder %s204_s15, %s204_s15 }
  0x7b   :  { %p3189_p5 = scmp.ne.s32.totalorder %s204_s15, %s3188_s23  ;;  %p3194_p7 = scmp.lt.s32.totalorder %s3188_s23, %s3188_s23 }
  0x7d   :  { %p3195_p8 = por %p3194_p7, %p3193_p6 }
  0x7f   :  { %p3196_p9 = pnand %p3195_p8, %p3189_p5 }
  0x81   :  { %3199 = shalt.err (!%p3196_p9)
}
  0x82   :  { %209 = dma.hbm_to_vmem [thread:$0]  %s3648_s12, 2048, %s204_s15, [#allocation12], %s3505_s2, %s3505_s2, %s3506_s7  }
  0x83   :  { %s3200_s20 = scalar_lea.hbm %s3683_s17, 2048 }
  0x84   :  { %p3201_p10 = scmp.ne.s32.totalorder %s3683_s17, %s3200_s20  ;;  %p3204_p11 = scmp.lt.u32.totalorder %s3200_s20, %s3683_s17 }
  0x86   :  { %p3206_p12 = pnand %p3204_p11, %p3201_p10 }
  0x88   :  { %3209 = shalt.err (!%p3206_p12)
}
  0x89   :  { %s3210_s26 = scalar_lea.vmem %s3771_s18, 2048  ;;  %p3215_p0 = scmp.lt.s32.totalorder %s3771_s18, %s3771_s18 }
  0x8a   :  { %p3211_p13 = scmp.ne.s32.totalorder %s3771_s18, %s3210_s26  ;;  %p3216_p1 = scmp.lt.s32.totalorder %s3210_s26, %s3210_s26 }
  0x8c   :  { %p3217_p2 = por %p3216_p1, %p3215_p0 }
  0x8e   :  { %p3218_p3 = pnand %p3217_p2, %p3211_p13 }
  0x90   :  { %3221 = shalt.err (!%p3218_p3)
}
  0x91   :  { %243 = dma.hbm_to_vmem [thread:$0]  %s3683_s17, 2048, %s3771_s18, [#allocation15], %s3505_s2, %s3505_s2, %s3506_s7  }
  0x92   :  { %s3509_s12 = smov [#allocation17]   ;;  %s3510_s0 = smov [#allocation2]  }
  0x93   :  { %s267_s28 = sshll.u32 %s3509_s12, 4  ;;  %s115_s1 = sshll.u32 %s3510_s0, 4  ;;  %s268_s28 = int_to_ptr.vmem [resolvable:$true] %s267_s28  ;;  %s3792_s1 = int_to_ptr.vmem [resolvable:$true] %s115_s1 }
  0x94   :  { %s3222_s10 = scalar_lea.hbm %s3708_s30, 8192 }
  0x95   :  { %p3223_p4 = scmp.ne.s32.totalorder %s3708_s30, %s3222_s10  ;;  %p3226_p5 = scmp.lt.u32.totalorder %s3222_s10, %s3708_s30 }
  0x97   :  { %p3228_p6 = pnand %p3226_p5, %p3223_p4 }
  0x99   :  { %3231 = shalt.err (!%p3228_p6)
}
  0x9a   :  { %s3232_s11 = scalar_lea.vmem %s268_s28, 8192  ;;  %p3237_p8 = scmp.lt.s32.totalorder %s268_s28, %s268_s28 }
  0x9b   :  { %p3233_p7 = scmp.ne.s32.totalorder %s268_s28, %s3232_s11  ;;  %p3238_p9 = scmp.lt.s32.totalorder %s3232_s11, %s3232_s11 }
  0x9d   :  { %p3239_p10 = por %p3238_p9, %p3237_p8 }
  0x9f   :  { %p3240_p11 = pnand %p3239_p10, %p3233_p7 }
  0xa1   :  { %3243 = shalt.err (!%p3240_p11)
}
  0xa2   :  { %s3511_s17 = smov 512   ;;  %s3512_s8 = smov 32  }
  0xa3   :  { %273 = dma.hbm_to_vmem [thread:$0]  %s3708_s30, 8192, %s268_s28, [#allocation18], %s3511_s17, %s3511_s17, %s3512_s8  }
  0xa4   :  { %s3244_s15 = scalar_lea.hbm %s3553_s21, 2048 }
  0xa5   :  { %p3245_p12 = scmp.ne.s32.totalorder %s3553_s21, %s3244_s15  ;;  %p3248_p13 = scmp.lt.u32.totalorder %s3244_s15, %s3553_s21 }
  0xa7   :  { %p3250_p0 = pnand %p3248_p13, %p3245_p12 }
  0xa9   :  { %3253 = shalt.err (!%p3250_p0)
}
  0xaa   :  { %s3254_s16 = scalar_lea.vmem %s3792_s1, 2048  ;;  %p3259_p2 = scmp.lt.s32.totalorder %s3792_s1, %s3792_s1 }
  0xab   :  { %p3255_p1 = scmp.ne.s32.totalorder %s3792_s1, %s3254_s16  ;;  %p3260_p3 = scmp.lt.s32.totalorder %s3254_s16, %s3254_s16 }
  0xad   :  { %p3261_p4 = por %p3260_p3, %p3259_p2 }
  0xaf   :  { %p3262_p5 = pnand %p3261_p4, %p3255_p1 }
  0xb1   :  { %3265 = shalt.err (!%p3262_p5)
}
  0xb2   :  { %121 = dma.hbm_to_vmem [thread:$0]  %s3553_s21, 2048, %s3792_s1, [#allocation3], %s3505_s2, %s3505_s2, %s3506_s7  }
  0xb3   :  { %s3513_s30 = smov [#allocation7]   ;;  %s3514_s22 = smov [#allocation10]  }
  0xb4   :  { %s153_s18 = sshll.u32 %s3513_s30, 4  ;;  %s185_s23 = sshll.u32 %s3514_s22, 4  ;;  %s154_s18 = int_to_ptr.vmem [resolvable:$true] %s153_s18  ;;  %s3813_s23 = int_to_ptr.vmem [resolvable:$true] %s185_s23 }
  0xb5   :  { %s3266_s20 = scalar_lea.hbm %s3598_s6, 2048 }
  0xb6   :  { %p3267_p6 = scmp.ne.s32.totalorder %s3598_s6, %s3266_s20  ;;  %p3270_p7 = scmp.lt.u32.totalorder %s3266_s20, %s3598_s6 }
  0xb8   :  { %p3272_p8 = pnand %p3270_p7, %p3267_p6 }
  0xba   :  { %3275 = shalt.err (!%p3272_p8)
}
  0xbb   :  { %s3276_s26 = scalar_lea.vmem %s154_s18, 2048  ;;  %p3281_p10 = scmp.lt.s32.totalorder %s154_s18, %s154_s18 }
  0xbc   :  { %p3277_p9 = scmp.ne.s32.totalorder %s154_s18, %s3276_s26  ;;  %p3282_p11 = scmp.lt.s32.totalorder %s3276_s26, %s3276_s26 }
  0xbe   :  { %p3283_p12 = por %p3282_p11, %p3281_p10 }
  0xc0   :  { %p3284_p13 = pnand %p3283_p12, %p3277_p9 }
  0xc2   :  { %3287 = shalt.err (!%p3284_p13)
}
  0xc3   :  { %159 = dma.hbm_to_vmem [thread:$0]  %s3598_s6, 2048, %s154_s18, [#allocation6], %s3505_s2, %s3505_s2, %s3506_s7  }
  0xc4   :  { %s3288_s21 = scalar_lea.hbm %s3628_s13, 2048 }
  0xc5   :  { %p3289_p0 = scmp.ne.s32.totalorder %s3628_s13, %s3288_s21  ;;  %p3292_p1 = scmp.lt.u32.totalorder %s3288_s21, %s3628_s13 }
  0xc7   :  { %p3294_p2 = pnand %p3292_p1, %p3289_p0 }
  0xc9   :  { %3297 = shalt.err (!%p3294_p2)
}
  0xca   :  { %s3298_s12 = scalar_lea.vmem %s3813_s23, 2048  ;;  %p3303_p4 = scmp.lt.s32.totalorder %s3813_s23, %s3813_s23 }
  0xcb   :  { %p3299_p3 = scmp.ne.s32.totalorder %s3813_s23, %s3298_s12  ;;  %p3304_p5 = scmp.lt.s32.totalorder %s3298_s12, %s3298_s12 }
  0xcd   :  { %p3305_p6 = por %p3304_p5, %p3303_p4 }
  0xcf   :  { %p3306_p7 = pnand %p3305_p6, %p3299_p3 }
  0xd1   :  { %3309 = shalt.err (!%p3306_p7)
}
  0xd2   :  { %191 = dma.hbm_to_vmem [thread:$0]  %s3628_s13, 2048, %s3813_s23, [#allocation9], %s3505_s2, %s3505_s2, %s3506_s7  }
  0xd3   :  { %s3515_s6 = smov [#allocation13]   ;;  %s3516_s0 = smov [#allocation16]  }
  0xd4   :  { %s223_s28 = sshll.u32 %s3515_s6, 4  ;;  %s255_s1 = sshll.u32 %s3516_s0, 4  ;;  %s224_s28 = int_to_ptr.vmem [resolvable:$true] %s223_s28  ;;  %s3834_s1 = int_to_ptr.vmem [resolvable:$true] %s255_s1 }
  0xd5   :  { %s3310_s10 = scalar_lea.hbm %s3673_s27, 2048 }
  0xd6   :  { %p3311_p8 = scmp.ne.s32.totalorder %s3673_s27, %s3310_s10  ;;  %p3314_p9 = scmp.lt.u32.totalorder %s3310_s10, %s3673_s27 }
  0xd8   :  { %p3316_p10 = pnand %p3314_p9, %p3311_p8 }
  0xda   :  { %3319 = shalt.err (!%p3316_p10)
}
  0xdb   :  { %s3320_s11 = scalar_lea.vmem %s224_s28, 2048  ;;  %p3325_p12 = scmp.lt.s32.totalorder %s224_s28, %s224_s28 }
  0xdc   :  { %p3321_p11 = scmp.ne.s32.totalorder %s224_s28, %s3320_s11  ;;  %p3326_p13 = scmp.lt.s32.totalorder %s3320_s11, %s3320_s11 }
  0xde   :  { %p3327_p0 = por %p3326_p13, %p3325_p12 }
  0xe0   :  { %p3328_p1 = pnand %p3327_p0, %p3321_p11 }
  0xe2   :  { %3331 = shalt.err (!%p3328_p1)
}
  0xe3   :  { %229 = dma.hbm_to_vmem [thread:$0]  %s3673_s27, 2048, %s224_s28, [#allocation12], %s3505_s2, %s3505_s2, %s3506_s7  }
  0xe4   :  { %s3332_s13 = scalar_lea.hbm %s3703_s19, 8192 }
  0xe5   :  { %p3333_p2 = scmp.ne.s32.totalorder %s3703_s19, %s3332_s13  ;;  %p3336_p3 = scmp.lt.u32.totalorder %s3332_s13, %s3703_s19 }
  0xe7   :  { %p3338_p4 = pnand %p3336_p3, %p3333_p2 }
  0xe9   :  { %3341 = shalt.err (!%p3338_p4)
}
  0xea   :  { %s3342_s15 = scalar_lea.vmem %s3834_s1, 8192  ;;  %p3347_p6 = scmp.lt.s32.totalorder %s3834_s1, %s3834_s1 }
  0xeb   :  { %p3343_p5 = scmp.ne.s32.totalorder %s3834_s1, %s3342_s15  ;;  %p3348_p7 = scmp.lt.s32.totalorder %s3342_s15, %s3342_s15 }
  0xed   :  { %p3349_p8 = por %p3348_p7, %p3347_p6 }
  0xef   :  { %p3350_p9 = pnand %p3349_p8, %p3343_p5 }
  0xf1   :  { %3353 = shalt.err (!%p3350_p9)
}
  0xf2   :  { %261 = dma.hbm_to_vmem [thread:$0]  %s3703_s19, 8192, %s3834_s1, [#allocation15], %s3511_s17, %s3511_s17, %s3512_s8  }
  0xf3   :  { %s3517_s27 = smov [#allocation19]   ;;  %s3518_s30 = smov [#allocation20]  }
  0xf4   :  { %s283_s16 = sshll.u32 %s3517_s27, 4  ;;  %s297_s18 = sshll.u32 %s3518_s30, 4  ;;  %s284_s16 = int_to_ptr.vmem [resolvable:$true] %s283_s16  ;;  %s3855_s18 = int_to_ptr.vmem [resolvable:$true] %s297_s18 }
  0xf5   :  { %s3354_s22 = scalar_lea.hbm %s3723_s14, 2048 }
  0xf6   :  { %p3355_p10 = scmp.ne.s32.totalorder %s3723_s14, %s3354_s22  ;;  %p3358_p11 = scmp.lt.u32.totalorder %s3354_s22, %s3723_s14 }
  0xf8   :  { %p3360_p12 = pnand %p3358_p11, %p3355_p10 }
  0xfa   :  { %3363 = shalt.err (!%p3360_p12)
}
  0xfb   :  { %s3364_s23 = scalar_lea.vmem %s284_s16, 2048  ;;  %p3369_p0 = scmp.lt.s32.totalorder %s284_s16, %s284_s16 }
  0xfc   :  { %p3365_p13 = scmp.ne.s32.totalorder %s284_s16, %s3364_s23  ;;  %p3370_p1 = scmp.lt.s32.totalorder %s3364_s23, %s3364_s23 }
  0xfe   :  { %p3371_p2 = por %p3370_p1, %p3369_p0 }
 0x100   :  { %p3372_p3 = pnand %p3371_p2, %p3365_p13 }
 0x102   :  { %3375 = shalt.err (!%p3372_p3)
}
 0x103   :  { %289 = dma.hbm_to_vmem [thread:$0]  %s3723_s14, 2048, %s284_s16, [#allocation18], %s3505_s2, %s3505_s2, %s3506_s7  }
 0x104   :  { %s3376_s19 = scalar_lea.hbm %s3733_s24, 2048 }
 0x105   :  { %p3377_p4 = scmp.ne.s32.totalorder %s3733_s24, %s3376_s19  ;;  %p3380_p5 = scmp.lt.u32.totalorder %s3376_s19, %s3733_s24 }
 0x107   :  { %p3382_p6 = pnand %p3380_p5, %p3377_p4 }
 0x109   :  { %3385 = shalt.err (!%p3382_p6)
}
 0x10a   :  { %s3386_s17 = scalar_lea.vmem %s3855_s18, 2048  ;;  %p3391_p8 = scmp.lt.s32.totalorder %s3855_s18, %s3855_s18 }
 0x10b   :  { %p3387_p7 = scmp.ne.s32.totalorder %s3855_s18, %s3386_s17  ;;  %p3392_p9 = scmp.lt.s32.totalorder %s3386_s17, %s3386_s17 }
 0x10d   :  { %p3393_p10 = por %p3392_p9, %p3391_p8 }
 0x10f   :  { %p3394_p11 = pnand %p3393_p10, %p3387_p7 }
 0x111   :  { %3397 = shalt.err (!%p3394_p11)
}
 0x112   :  { %303 = dma.hbm_to_vmem [thread:$0]  %s3733_s24, 2048, %s3855_s18, [#allocation21], %s3505_s2, %s3505_s2, %s3506_s7  }
 0x113   :  { %3442 = dma.done.wait [#allocation3], 2048  }
 0x114   :  { %3443 = vsyncadd [#allocation3], 4294965248 }
 0x115   :  { %3444 = dma.done.wait [#allocation6], 4096  }
 0x116   :  { %3445 = vsyncadd [#allocation6], 4294963200 }
 0x117   :  { %3446 = dma.done.wait [#allocation9], 4096  }
 0x118   :  { %3447 = vsyncadd [#allocation9], 4294963200 }
 0x119   :  { %3448 = dma.done.wait [#allocation12], 4096  }
 0x11a   :  { %3449 = vsyncadd [#allocation12], 4294963200 }
 0x11b   :  { %3450 = dma.done.wait [#allocation15], 10240  }
 0x11c   :  { %3451 = vsyncadd [#allocation15], 4294957056 }
 0x11d   :  { %3452 = dma.done.wait [#allocation18], 10240  }
 0x11e   :  { %3453 = vsyncadd [#allocation18], 4294957056 }
 0x11f   :  { %3454 = dma.done.wait [#allocation21], 2048  }
 0x120   :  { %3455 = vsyncadd [#allocation21], 4294965248  ;;  %v3519_v0 = vmov 0.0|0.0   ;;  %vm3520_vm0 = vmmov 0   ;;  %v3521_v1 = vmov 0.0   ;;  %v344_v2 = vld [vmem:[#allocation2] sm:$0xff]  ;;  %v440_v39 = vlaneseq }
 0x121   :  { %2647 = vmatprep.subr.bf16.mxu0 %v3519_v0  ;;  %2329 = vmatprep.mubr.msk.f32.mxu0 %vm3520_vm0, %v3521_v1  ;;  %v345_v3 = vld [vmem:[#allocation2 + $0x8] sm:$0xff]  ;;  %v346_v4 = vld [vmem:[#allocation2 + $0x10] sm:$0xff]  ;;  %v347_v6 = vld [vmem:[#allocation2 + $0x18] sm:$0xff]  ;;  %vm443_vm1 = vcmask 1041408   ;;  %s4108_s14 = sld [smem:[#allocation38_spill]]  ;;  %s4109_s24 = sld [smem:[#allocation39_spill]] }
 0x122   :  { %2671 = vmatprep.subr.bf16.mxu1 %v3519_v0  ;;  %2364 = vmatprep.mubr.msk.f32.mxu1 %vm3520_vm0, %v3521_v1  ;;  %v2648_v5 = vpack.c.bf16 %v345_v3, %v344_v2  ;;  %v2651_v7 = vpack.c.bf16 %v347_v6, %v346_v4  ;;  %v348_v8 = vld [vmem:[#allocation2 + $0x20] sm:$0xff]  ;;  %v349_v9 = vld [vmem:[#allocation2 + $0x28] sm:$0xff]  ;;  %v350_v11 = vld [vmem:[#allocation2 + $0x30] sm:$0xff]  ;;  %v3898_v40 = vand.u32 127, %v440_v39  ;;  %v3522_v4 = vmov 0   ;;  %s4111_s2 = sld [smem:[#allocation41_spill]] }
 0x123   :  { %v2654_v10 = vpack.c.bf16 %v349_v9, %v348_v8  ;;  %v351_v12 = vld [vmem:[#allocation2 + $0x38] sm:$0xff]  ;;  %v352_v14 = vld [vmem:[#allocation2 + $0x40] sm:$0xff]  ;;  %v353_v15 = vld [vmem:[#allocation2 + $0x48] sm:$0xff]  ;;  %3084 = vset.pattern.permute.xlu1 %v3522_v4  ;;  %3085 = vset.pattern.permute.xlu0 %v3522_v4  ;;  %s4112_s7 = sld [smem:[#allocation42_spill]]  ;;  %s4113_s8 = sld [smem:[#allocation43_spill]] }
 0x124   :  { %2649 = vmatpush3.bf16.msra.mxu0 %v2648_v5  ;;  %v2657_v13 = vpack.c.bf16 %v351_v12, %v350_v11  ;;  %v2660_v16 = vpack.c.bf16 %v353_v15, %v352_v14  ;;  %v354_v17 = vld [vmem:[#allocation2 + $0x50] sm:$0xff]  ;;  %v355_v18 = vld [vmem:[#allocation2 + $0x58] sm:$0xff]  ;;  %v356_v20 = vld [vmem:[#allocation2 + $0x60] sm:$0xff]  ;;  %vm442_vm2 = vcmp.lt.s32.totalorder %v3898_v40, 51  ;;  %s4114_s20 = sld [smem:[#allocation44_spill]]  ;;  %s4115_s26 = sld [smem:[#allocation45_spill]] }
 0x125   :  { %2650 = vmatprep.subr.bf16.mxu0 %v3519_v0  ;;  %v2663_v19 = vpack.c.bf16 %v355_v18, %v354_v17  ;;  %v357_v21 = vld [vmem:[#allocation2 + $0x68] sm:$0xff]  ;;  %v358_v23 = vld [vmem:[#allocation2 + $0x70] sm:$0xff]  ;;  %v359_v24 = vld [vmem:[#allocation2 + $0x78] sm:$0xff]  ;;  %s4116_s21 = sld [smem:[#allocation46_spill]]  ;;  %vm938_vm4 = vcmp.lt.s32.totalorder %v3898_v40, 64  ;;  %s4117_s12 = sld [smem:[#allocation47_spill]] }
 0x126   :  { %v2666_v22 = vpack.c.bf16 %v357_v21, %v356_v20  ;;  %v2669_v25 = vpack.c.bf16 %v359_v24, %v358_v23  ;;  %v342_v26 = vld [vmem:[%s3533_s5] sm:$0x3]  ;;  %v476_v34 = vld [vmem:[#allocation5 + $0x8] sm:$0xff]  ;;  %v477_v35 = vld [vmem:[#allocation5 + $0x10] sm:$0xff]  ;;  %s4106_s5 = sld [smem:[#allocation36_spill]]  ;;  %s4118_s6 = sld [smem:[#allocation48_spill]] }
 0x127   :  { %v2095_v27 = vld [vmem:[%s3558_s25] ss:$0 sm:$0xff]  ;;  %v478_v37 = vld [vmem:[#allocation5 + $0x18] sm:$0xff]  ;;  %v480_v48 = vld [vmem:[#allocation5 + $0x28] sm:$0xff]  ;;  %s4107_s25 = sld [smem:[#allocation37_spill]]  ;;  %s4119_s28 = sld [smem:[#allocation49_spill]] }
 0x128   :  { %2652 = vmatpush3.bf16.msra.mxu0 %v2651_v7  ;;  %v475_v33 = vld [vmem:[#allocation5] sm:$0xff]  ;;  %v2675_v38 = vpack.c.bf16 %v478_v37, %v477_v35  ;;  %v481_v50 = vld [vmem:[#allocation5 + $0x30] sm:$0xff]  ;;  %v482_v51 = vld [vmem:[#allocation5 + $0x38] sm:$0xff]  ;;  %s4120_s0 = sld [smem:[#allocation50_spill]]  ;;  %s4121_s1 = sld [smem:[#allocation51_spill]] }
 0x129   :  { %2653 = vmatprep.subr.bf16.mxu0 %v3519_v0  ;;  %v2672_v36 = vpack.c.bf16 %v476_v34, %v475_v33  ;;  %v479_v47 = vld [vmem:[#allocation5 + $0x20] sm:$0xff]  ;;  %v2681_v52 = vpack.c.bf16 %v482_v51, %v481_v50  ;;  %v484_v54 = vld [vmem:[#allocation5 + $0x48] sm:$0xff]  ;;  %v485_v56 = vld [vmem:[#allocation5 + $0x50] sm:$0xff]  ;;  %s4122_s10 = sld [smem:[#allocation52_spill]]  ;;  %s4123_s11 = sld [smem:[#allocation53_spill]] }
 0x12a   :  { %v2678_v49 = vpack.c.bf16 %v480_v48, %v479_v47  ;;  %v483_v53 = vld [vmem:[#allocation5 + $0x40] sm:$0xff]  ;;  %v486_v57 = vld [vmem:[#allocation5 + $0x58] sm:$0xff]  ;;  %v488_v60 = vld [vmem:[#allocation5 + $0x68] sm:$0xff]  ;;  %s4124_s13 = sld [smem:[#allocation54_spill]]  ;;  %s4125_s15 = sld [smem:[#allocation34_spill]] }
 0x12b   :  { %2673 = vmatpush3.bf16.msra.mxu1 %v2672_v36  ;;  %v2684_v55 = vpack.c.bf16 %v484_v54, %v483_v53  ;;  %v2687_v58 = vpack.c.bf16 %v486_v57, %v485_v56  ;;  %v487_v59 = vld [vmem:[#allocation5 + $0x60] sm:$0xff]  ;;  %v489_v62 = vld [vmem:[#allocation5 + $0x70] sm:$0xff]  ;;  %v490_v63 = vld [vmem:[#allocation5 + $0x78] sm:$0xff]  ;;  %s4126_s27 = sld [smem:[#allocation55_spill]]  ;;  %s4127_s16 = sld [smem:[#allocation56_spill]] }
 0x12c   :  { %2655 = vmatpush3.bf16.msra.mxu0 %v2654_v10  ;;  %2674 = vmatprep.subr.bf16.mxu1 %v3519_v0  ;;  %v2690_v61 = vpack.c.bf16 %v488_v60, %v487_v59  ;;  %v2693_v2 = vpack.c.bf16 %v490_v63, %v489_v62  ;;  %v343_v3 = vld [vmem:[%s3538_s9] sm:$0x3]  ;;  %v620_v34 = vld [vmem:[#allocation7 + $0x10] sm:$0xff]  ;;  %v621_v35 = vld [vmem:[#allocation7 + $0x18] sm:$0xff]  ;;  %s4110_s9 = sld [smem:[#allocation40_spill]]  ;;  %s4128_s30 = sld [smem:[#allocation57_spill]] }
 0x12d   :  { %2656 = vmatprep.subr.bf16.mxu0 %v3519_v0  ;;  %494 = vperm.xlu1 %3084, %v343_v3   ;;  %v2096_v9 = vld [vmem:[%s4106_s5] ss:$0 sm:$0xff]  ;;  %v2699_v36 = vpack.c.bf16 %v621_v35, %v620_v34  ;;  %v628_v48 = vld [vmem:[#allocation7 + $0x50] sm:$0xff]  ;;  %s4129_s18 = sld [smem:[#allocation58_spill]]  ;;  %s4130_s22 = sld [smem:[#allocation35_spill]] }
 0x12e   :  { %v2097_v11 = vld [vmem:[%s4107_s25] ss:$0 sm:$0xff]  ;;  %v632_v54 = vld [vmem:[#allocation7 + $0x70] sm:$0xff]  ;;  %s4131_s23 = sld [smem:[#allocation59_spill]]  ;;  %s3523_s19 = smov [#allocation23]  }
 0x12f   :  { %2676 = vmatpush3.bf16.msra.mxu1 %v2675_v38  ;;  %v2099_v20 = vld [vmem:[%s4109_s24] ss:$0 sm:$0xff]  ;;  %v623_v38 = vld [vmem:[#allocation7 + $0x28] sm:$0xff]  ;;  %v714_v59 = vld [vmem:[#allocation8 + $0x10] sm:$0xff]  ;;  %s2033_s17 = sshll.u32 %s3523_s19, 4  ;;  %s2034_s17 = int_to_ptr.vmem [resolvable:$true] %s2033_s17 }
 0x130   :  { %2658 = vmatpush3.bf16.msra.mxu0 %v2657_v13  ;;  %2677 = vmatprep.subr.bf16.mxu1 %v3519_v0  ;;  %v622_v37 = vld [vmem:[#allocation7 + $0x20] sm:$0xff]  ;;  %v718_v4 = vld [vmem:[#allocation8 + $0x30] sm:$0xff]  ;;  %s3398_s5 = scalar_lea.vmem %s2034_s17, 32  ;;  %p3403_p13 = scmp.lt.s32.totalorder %s2034_s17, %s2034_s17 }
 0x131   :  { %2659 = vmatprep.subr.bf16.mxu0 %v3519_v0  ;;  %v630_v51 = vld [vmem:[#allocation7 + $0x60] sm:$0xff]  ;;  %p3399_p12 = scmp.ne.s32.totalorder %s2034_s17, %s3398_s5  ;;  %p3404_p0 = scmp.lt.s32.totalorder %s3398_s5, %s3398_s5 }
 0x132   :  { %v712_v57 = vld [vmem:[#allocation8] sm:$0xff] }
 0x133   :  { %2679 = vmatpush3.bf16.msra.mxu1 %v2678_v49  ;;  %v629_v49 = vld [vmem:[#allocation7 + $0x58] sm:$0xff]  ;;  %v716_v63 = vld [vmem:[#allocation8 + $0x20] sm:$0xff]  ;;  %p3405_p1 = por %p3404_p0, %p3403_p13 }
 0x134   :  { %2661 = vmatpush3.bf16.msra.mxu0 %v2660_v16  ;;  %2680 = vmatprep.subr.bf16.mxu1 %v3519_v0  ;;  %v2098_v16 = vld [vmem:[%s4108_s14] ss:$0 sm:$0xff]  ;;  %v2711_v50 = vpack.c.bf16 %v629_v49, %v628_v48 }
 0x135   :  { %2662 = vmatprep.subr.bf16.mxu0 %v3519_v0  ;;  %p3406_p2 = pnand %p3405_p1, %p3399_p12 }
 0x137   :  { %2682 = vmatpush3.bf16.msra.mxu1 %v2681_v52  ;;  %v631_v52 = vld [vmem:[#allocation7 + $0x68] sm:$0xff] }
 0x138   :  { %2664 = vmatpush3.bf16.msra.mxu0 %v2663_v19  ;;  %2683 = vmatprep.subr.bf16.mxu1 %v3519_v0  ;;  %v2714_v53 = vpack.c.bf16 %v631_v52, %v630_v51  ;;  %v842_v52 = vld [vmem:[#allocation10] sm:$0xff] }
 0x139   :  { %2665 = vmatprep.subr.bf16.mxu0 %v3519_v0 }
 0x13b   :  { %2685 = vmatpush3.bf16.msra.mxu1 %v2684_v55  ;;  %v633_v55 = vld [vmem:[#allocation7 + $0x78] sm:$0xff] }
 0x13c   :  { %2667 = vmatpush3.bf16.msra.mxu0 %v2666_v22  ;;  %2686 = vmatprep.subr.bf16.mxu1 %v3519_v0  ;;  %v2717_v56 = vpack.c.bf16 %v633_v55, %v632_v54  ;;  %v844_v55 = vld [vmem:[#allocation10 + $0x10] sm:$0xff] }
 0x13d   :  { %2668 = vmatprep.subr.bf16.mxu0 %v3519_v0 }
 0x13f   :  { %2688 = vmatpush3.bf16.msra.mxu1 %v2687_v58  ;;  %v713_v58 = vld [vmem:[#allocation8 + $0x8] sm:$0xff] }
 0x140   :  { %2670 = vmatpush3.bf16.msra.mxu0 %v2669_v25  ;;  %2689 = vmatprep.subr.bf16.mxu1 %v3519_v0  ;;  %v2720_v60 = vpack.c.bf16 %v713_v58, %v712_v57  ;;  %v846_v58 = vld [vmem:[#allocation10 + $0x20] sm:$0xff] }
 0x141   :  { %2695 = vmatprep.subr.bf16.mxu0 %v3519_v0 }
 0x143   :  { %2330 = vmatmul.mubr.f32.vlgmr.msra.gmra.mrb[0].mxu0 %v342_v26  ;;  %2691 = vmatpush3.bf16.msra.mxu1 %v2690_v61  ;;  %v715_v61 = vld [vmem:[#allocation8 + $0x18] sm:$0xff] }
 0x144   :  { %2399 = vmatprep.mubr.msk.f32.mxu0 %vm3520_vm0, %v3521_v1  ;;  %2692 = vmatprep.subr.bf16.mxu1 %v3519_v0  ;;  %v2723_v62 = vpack.c.bf16 %v715_v61, %v714_v59  ;;  %v847_v59 = vld [vmem:[#allocation10 + $0x28] sm:$0xff] }
 0x145   :  { %v2750_v61 = vpack.c.bf16 %v847_v59, %v846_v58  ;;  %v980_v58 = vld [vmem:[#allocation11 + $0x50] sm:$0xff]  ;;  %v981_v59 = vld [vmem:[#allocation11 + $0x58] sm:$0xff] }
 0x147   :  { %2694 = vmatpush3.bf16.msra.mxu1 %v2693_v2  ;;  %v717_v2 = vld [vmem:[#allocation8 + $0x28] sm:$0xff] }
 0x148   :  { %2719 = vmatprep.subr.bf16.mxu1 %v3519_v0  ;;  %v2726_v3 = vpack.c.bf16 %v717_v2, %v716_v63  ;;  %v850_v2 = vld [vmem:[#allocation10 + $0x40] sm:$0xff] }
 0x1ac   :  { %v3919_v17 = vpop.permute.xlu1 %494 }
 0x1ad   :  { %v503_v18 = vmul.f32 %v2098_v16, %v3919_v17 }
 0x216   :  { %v433_v28 = vpop.f32.mrb[0].mxu0 }
 0x217   :  { %v434_v29 = vadd.f32 %v2095_v27, %v433_v28  ;;  %v2331_v30 = vpop.f32.mrb[1].mxu0 }
 0x219   :  { %v437_v31 = vmul.f32 1.1, %v434_v29 }
 0x21b   :  { %v444_v32 = vsel %vm443_vm1, %v437_v31, 0.0 }
 0x21c   :  { %445 = vadd.xlane.f32.xlu0 %v444_v32  ;;  %v619_v32 = vld [vmem:[#allocation7 + $0x8] sm:$0xff] }
 0x2a9   :  { %v446_v41 = vpop.xlane.xlu0 %445 }
 0x2aa   :  { %v447_v42 = vmul.f32 0.019607844, %v446_v41  ;;  %v2702_v41 = vpack.c.bf16 %v623_v38, %v622_v37 }
 0x2ac   :  { %v448_v43 = vsub.f32 %v437_v31, %v447_v42  ;;  %v618_v31 = vld [vmem:[#allocation7] sm:$0xff]  ;;  %v624_v42 = vld [vmem:[#allocation7 + $0x30] sm:$0xff] }
 0x2ad   :  { %v2696_v33 = vpack.c.bf16 %v619_v32, %v618_v31  ;;  %v726_v32 = vld [vmem:[#allocation8 + $0x70] sm:$0xff] }
 0x2ae   :  { %v449_v44 = vsel %vm442_vm2, %v448_v43, 0.0  ;;  %v625_v43 = vld [vmem:[#allocation7 + $0x38] sm:$0xff] }
 0x2af   :  { %v450_v45 = vmul.f32 %v449_v44, %v449_v44  ;;  %2697 = vmatpush3.bf16.msra.mxu0 %v2696_v33  ;;  %v727_v33 = vld [vmem:[#allocation8 + $0x78] sm:$0xff] }
 0x2b0   :  { %2698 = vmatprep.subr.bf16.mxu0 %v3519_v0  ;;  %v2741_v34 = vpack.c.bf16 %v727_v33, %v726_v32 }
 0x2b1   :  { %v451_v46 = vsel %vm443_vm1, %v450_v45, 0.0  ;;  %v626_v45 = vld [vmem:[#allocation7 + $0x40] sm:$0xff] }
 0x2b2   :  { %452 = vadd.xlane.f32.xlu0 %v451_v46  ;;  %v627_v46 = vld [vmem:[#allocation7 + $0x48] sm:$0xff] }
 0x2b3   :  { %2700 = vmatpush3.bf16.msra.mxu0 %v2699_v36  ;;  %v2708_v47 = vpack.c.bf16 %v627_v46, %v626_v45 }
 0x2b4   :  { %2701 = vmatprep.subr.bf16.mxu0 %v3519_v0 }
 0x2b7   :  { %2703 = vmatpush3.bf16.msra.mxu0 %v2702_v41  ;;  %v2104_v41 = vld [vmem:[%s4113_s8] ss:$0 sm:$0xff] }
 0x2b8   :  { %2704 = vmatprep.subr.bf16.mxu0 %v3519_v0 }
 0x33f   :  { %v453_v5 = vpop.xlane.xlu0 %452 }
 0x340   :  { %v454_v6 = vmul.f32 0.019607844, %v453_v5  ;;  %v719_v5 = vld [vmem:[#allocation8 + $0x38] sm:$0xff] }
 0x342   :  { %v455_v7 = vadd.f32 1e-05, %v454_v6  ;;  %v2729_v6 = vpack.c.bf16 %v719_v5, %v718_v4  ;;  %v852_v5 = vld [vmem:[#allocation10 + $0x50] sm:$0xff] }
 0x344   :  { %3086 = vrsqrt.f32 %v455_v7  ;;  %v720_v7 = vld [vmem:[#allocation8 + $0x40] sm:$0xff] }
 0x34e   :  { %v3087_v8 = vpop.eup %3086 }
 0x34f   :  { %v457_v10 = vmul.f32 %v3087_v8, %v449_v44  ;;  %v2705_v44 = vpack.c.bf16 %v625_v43, %v624_v42  ;;  %v721_v8 = vld [vmem:[#allocation8 + $0x48] sm:$0xff] }
 0x351   :  { %v464_v12 = vmul.f32 %v2096_v9, %v457_v10  ;;  %2706 = vmatpush3.bf16.msra.mxu0 %v2705_v44  ;;  %v2732_v9 = vpack.c.bf16 %v721_v8, %v720_v7  ;;  %v722_v10 = vld [vmem:[#allocation8 + $0x50] sm:$0xff]  ;;  %v854_v8 = vld [vmem:[#allocation10 + $0x60] sm:$0xff] }
 0x352   :  { %2707 = vmatprep.subr.bf16.mxu0 %v3519_v0 }
 0x353   :  { %v471_v13 = vadd.f32 %v2097_v11, %v464_v12  ;;  %v723_v11 = vld [vmem:[#allocation8 + $0x58] sm:$0xff] }
 0x354   :  { %v2735_v12 = vpack.c.bf16 %v723_v11, %v722_v10  ;;  %v856_v11 = vld [vmem:[#allocation10 + $0x70] sm:$0xff] }
 0x355   :  { %vm472_vm3 = vcmp.gt.f32.partialorder %v471_v13, 0.0  ;;  %v473_v14 = vmul.f32 0.1, %v471_v13  ;;  %2709 = vmatpush3.bf16.msra.mxu0 %v2708_v47 }
 0x356   :  { %2710 = vmatprep.subr.bf16.mxu0 %v3519_v0 }
 0x357   :  { %v3913_v15 = vsel %vm472_vm3, %v471_v13, %v473_v14  ;;  %v724_v13 = vld [vmem:[#allocation8 + $0x60] sm:$0xff]  ;;  %v725_v14 = vld [vmem:[#allocation8 + $0x68] sm:$0xff] }
 0x358   :  { %2365 = vmatmul.mubr.f32.vlgmr.msra.gmra.mrb[0].mxu1 %v3913_v15  ;;  %v2738_v16 = vpack.c.bf16 %v725_v14, %v724_v13 }
 0x359   :  { %2434 = vmatprep.mubr.msk.f32.mxu1 %vm3520_vm0, %v3521_v1  ;;  %2712 = vmatpush3.bf16.msra.mxu0 %v2711_v50 }
 0x35a   :  { %2713 = vmatprep.subr.bf16.mxu0 %v3519_v0  ;;  %2721 = vmatpush3.bf16.msra.mxu1 %v2720_v60  ;;  %v848_v60 = vld [vmem:[#allocation10 + $0x30] sm:$0xff] }
 0x35b   :  { %2722 = vmatprep.subr.bf16.mxu1 %v3519_v0 }
 0x35d   :  { %2715 = vmatpush3.bf16.msra.mxu0 %v2714_v53  ;;  %v843_v53 = vld [vmem:[#allocation10 + $0x8] sm:$0xff] }
 0x35e   :  { %2716 = vmatprep.subr.bf16.mxu0 %v3519_v0  ;;  %2724 = vmatpush3.bf16.msra.mxu1 %v2723_v62  ;;  %v2744_v54 = vpack.c.bf16 %v843_v53, %v842_v52  ;;  %v849_v62 = vld [vmem:[#allocation10 + $0x38] sm:$0xff]  ;;  %v976_v52 = vld [vmem:[#allocation11 + $0x30] sm:$0xff] }
 0x35f   :  { %2725 = vmatprep.subr.bf16.mxu1 %v3519_v0  ;;  %v2753_v63 = vpack.c.bf16 %v849_v62, %v848_v60  ;;  %v977_v53 = vld [vmem:[#allocation11 + $0x38] sm:$0xff]  ;;  %v2783_v60 = vpack.c.bf16 %v981_v59, %v980_v58  ;;  %v983_v62 = vld [vmem:[#allocation11 + $0x68] sm:$0xff]  ;;  %v1204_v58 = vld [vmem:[#allocation14 + $0x10] sm:$0xff] }
 0x361   :  { %2718 = vmatpush3.bf16.msra.mxu0 %v2717_v56  ;;  %v845_v56 = vld [vmem:[#allocation10 + $0x18] sm:$0xff] }
 0x362   :  { %2743 = vmatprep.subr.bf16.mxu0 %v3519_v0  ;;  %2727 = vmatpush3.bf16.msra.mxu1 %v2726_v3  ;;  %v2747_v57 = vpack.c.bf16 %v845_v56, %v844_v55  ;;  %v851_v3 = vld [vmem:[#allocation10 + $0x48] sm:$0xff]  ;;  %v978_v55 = vld [vmem:[#allocation11 + $0x40] sm:$0xff] }
 0x363   :  { %2728 = vmatprep.subr.bf16.mxu1 %v3519_v0  ;;  %v2756_v4 = vpack.c.bf16 %v851_v3, %v850_v2  ;;  %v979_v56 = vld [vmem:[#allocation11 + $0x48] sm:$0xff]  ;;  %v984_v2 = vld [vmem:[#allocation11 + $0x70] sm:$0xff]  ;;  %v985_v3 = vld [vmem:[#allocation11 + $0x78] sm:$0xff] }
 0x366   :  { %2730 = vmatpush3.bf16.msra.mxu1 %v2729_v6  ;;  %v853_v6 = vld [vmem:[#allocation10 + $0x58] sm:$0xff] }
 0x367   :  { %2731 = vmatprep.subr.bf16.mxu1 %v3519_v0  ;;  %v2759_v7 = vpack.c.bf16 %v853_v6, %v852_v5 }
 0x36a   :  { %2733 = vmatpush3.bf16.msra.mxu1 %v2732_v9  ;;  %v855_v9 = vld [vmem:[#allocation10 + $0x68] sm:$0xff] }
 0x36b   :  { %2734 = vmatprep.subr.bf16.mxu1 %v3519_v0  ;;  %v2762_v10 = vpack.c.bf16 %v855_v9, %v854_v8  ;;  %v2109_v9 = vld [vmem:[%s4117_s12] ss:$0 sm:$0xff] }
 0x36e   :  { %2736 = vmatpush3.bf16.msra.mxu1 %v2735_v12  ;;  %v857_v12 = vld [vmem:[#allocation10 + $0x78] sm:$0xff] }
 0x36f   :  { %2737 = vmatprep.subr.bf16.mxu1 %v3519_v0  ;;  %v2765_v13 = vpack.c.bf16 %v857_v12, %v856_v11  ;;  %v2110_v11 = vld [vmem:[%s4118_s6] ss:$0 sm:$0xff] }
 0x372   :  { %2739 = vmatpush3.bf16.msra.mxu1 %v2738_v16 }
 0x373   :  { %2740 = vmatprep.subr.bf16.mxu1 %v3519_v0 }
 0x376   :  { %2742 = vmatpush3.bf16.msra.mxu1 %v2741_v34 }
 0x377   :  { %2767 = vmatprep.subr.bf16.mxu1 %v3519_v0 }
 0x42b   :  { %v570_v19 = vpop.f32.mrb[0].mxu1 }
 0x42c   :  { %v571_v21 = vadd.f32 %v570_v19, %v503_v18  ;;  %v2366_v22 = vpop.f32.mrb[1].mxu1 }
 0x42d   :  { %v2100_v22 = vld [vmem:[%s4110_s9] ss:$0 sm:$0xff] }
 0x42e   :  { %v581_v23 = vadd.f32 %v2099_v20, %v571_v21 }
 0x430   :  { %v584_v24 = vsel %vm443_vm1, %v581_v23, 0.0 }
 0x431   :  { %585 = vadd.xlane.f32.xlu1 %v584_v24  ;;  %v2101_v24 = vld [vmem:[%s4111_s2] ss:$0 sm:$0xff] }
 0x4be   :  { %v586_v25 = vpop.xlane.xlu1 %585 }
 0x4bf   :  { %v587_v26 = vmul.f32 0.019607844, %v586_v25 }
 0x4c1   :  { %v588_v27 = vsub.f32 %v581_v23, %v587_v26 }
 0x4c3   :  { %v3926_v28 = vsel %vm442_vm2, %v588_v27, 0.0 }
 0x4c4   :  { %v590_v29 = vmul.f32 %v3926_v28, %v3926_v28 }
 0x4c6   :  { %v591_v30 = vsel %vm443_vm1, %v590_v29, 0.0 }
 0x4c7   :  { %592 = vadd.xlane.f32.xlu0 %v591_v30 }
 0x554   :  { %v593_v18 = vpop.xlane.xlu0 %592 }
 0x555   :  { %v594_v19 = vmul.f32 0.019607844, %v593_v18 }
 0x557   :  { %v595_v20 = vadd.f32 1e-05, %v594_v19 }
 0x559   :  { %3088 = vrsqrt.f32 %v595_v20  ;;  %v2105_v20 = vld [vmem:[%s4114_s20] ss:$0 sm:$0xff] }
 0x563   :  { %v3089_v21 = vpop.eup %3088 }
 0x564   :  { %v597_v23 = vmul.f32 %v3089_v21, %v3926_v28  ;;  %v2103_v28 = vld [vmem:[%s4112_s7] ss:$0 sm:$0xff] }
 0x566   :  { %v604_v25 = vmul.f32 %v2100_v22, %v597_v23  ;;  %v2106_v22 = vld [vmem:[%s4115_s26] ss:$0 sm:$0xff] }
 0x568   :  { %v611_v26 = vadd.f32 %v2101_v24, %v604_v25 }
 0x56a   :  { %v2102_v27 = vmul.f32 -1.442695, %v611_v26 }
 0x56c   :  { %3090 = vpow2.f32 %v2102_v27 }
 0x576   :  { %v3091_v29 = vpop.eup %3090 }
 0x577   :  { %v615_v30 = vadd.f32 1.0, %v3091_v29 }
 0x579   :  { %3092 = vrcp.f32 %v615_v30 }
 0x583   :  { %v3093_v31 = vpop.eup %3092 }
 0x584   :  { %2400 = vmatmul.mubr.f32.vlgmr.msra.gmra.mrb[2].mxu0 %v3093_v31  ;;  %v2108_v31 = vld [vmem:[%s4116_s21] ss:$0 sm:$0xff] }
 0x585   :  { %2469 = vmatprep.mubr.msk.f32.mxu0 %vm3520_vm0, %v3521_v1  ;;  %2745 = vmatpush3.bf16.msra.mxu0 %v2744_v54  ;;  %v2777_v54 = vpack.c.bf16 %v977_v53, %v976_v52  ;;  %v1122_v53 = vld [vmem:[#allocation13 + $0x70] sm:$0xff] }
 0x586   :  { %2746 = vmatprep.subr.bf16.mxu0 %v3519_v0 }
 0x589   :  { %2748 = vmatpush3.bf16.msra.mxu0 %v2747_v57  ;;  %v2780_v57 = vpack.c.bf16 %v979_v56, %v978_v55  ;;  %v1202_v56 = vld [vmem:[#allocation14] sm:$0xff] }
 0x58a   :  { %2749 = vmatprep.subr.bf16.mxu0 %v3519_v0 }
 0x58d   :  { %2751 = vmatpush3.bf16.msra.mxu0 %v2750_v61  ;;  %v982_v61 = vld [vmem:[#allocation11 + $0x60] sm:$0xff] }
 0x58e   :  { %2752 = vmatprep.subr.bf16.mxu0 %v3519_v0 }
 0x591   :  { %2754 = vmatpush3.bf16.msra.mxu0 %v2753_v63  ;;  %v2786_v63 = vpack.c.bf16 %v983_v62, %v982_v61  ;;  %v1206_v62 = vld [vmem:[#allocation14 + $0x20] sm:$0xff] }
 0x592   :  { %2755 = vmatprep.subr.bf16.mxu0 %v3519_v0 }
 0x595   :  { %2757 = vmatpush3.bf16.msra.mxu0 %v2756_v4  ;;  %v2789_v4 = vpack.c.bf16 %v985_v3, %v984_v2  ;;  %v1208_v3 = vld [vmem:[#allocation14 + $0x30] sm:$0xff] }
 0x596   :  { %2758 = vmatprep.subr.bf16.mxu0 %v3519_v0 }
 0x599   :  { %2760 = vmatpush3.bf16.msra.mxu0 %v2759_v7 }
 0x59a   :  { %2761 = vmatprep.subr.bf16.mxu0 %v3519_v0 }
 0x59d   :  { %2763 = vmatpush3.bf16.msra.mxu0 %v2762_v10 }
 0x59e   :  { %2764 = vmatprep.subr.bf16.mxu0 %v3519_v0 }
 0x5a1   :  { %2766 = vmatpush3.bf16.msra.mxu0 %v2765_v13 }
 0x5a2   :  { %2791 = vmatprep.subr.bf16.mxu0 %v3519_v0 }
 0x657   :  { %v707_v35 = vpop.f32.mrb[2].mxu0 }
 0x658   :  { %v708_v36 = vadd.f32 %v2103_v28, %v707_v35  ;;  %v2401_v37 = vpop.f32.mrb[3].mxu0 }
 0x659   :  { %v971_v37 = vld [vmem:[#allocation11 + $0x8] sm:$0xff] }
 0x65a   :  { %v711_v38 = vmax.f32 %v708_v36, 0.0  ;;  %v970_v36 = vld [vmem:[#allocation11] sm:$0xff] }
 0x65c   :  { %2435 = vmatmul.mubr.f32.vlgmr.msra.gmra.mrb[2].mxu1 %v711_v38  ;;  %v972_v38 = vld [vmem:[#allocation11 + $0x10] sm:$0xff] }
 0x65d   :  { %2504 = vmatprep.mubr.msk.f32.mxu1 %vm3520_vm0, %v3521_v1 }
 0x72f   :  { %v801_v42 = vpop.f32.mrb[2].mxu1 }
 0x730   :  { %v802_v43 = vadd.f32 %v2104_v41, %v801_v42  ;;  %v2436_v44 = vpop.f32.mrb[3].mxu1  ;;  %v2768_v41 = vpack.c.bf16 %v971_v37, %v970_v36  ;;  %v973_v42 = vld [vmem:[#allocation11 + $0x18] sm:$0xff]  ;;  %v1112_v37 = vld [vmem:[#allocation13 + $0x20] sm:$0xff] }
 0x732   :  { %v807_v45 = vsel %vm443_vm1, %v802_v43, 0.0  ;;  %2769 = vmatpush3.bf16.msra.mxu1 %v2768_v41 }
 0x733   :  { %808 = vadd.xlane.f32.xlu0 %v807_v45  ;;  %2770 = vmatprep.subr.bf16.mxu1 %v3519_v0 }
 0x7c0   :  { %v809_v46 = vpop.xlane.xlu0 %808 }
 0x7c1   :  { %v810_v47 = vmul.f32 0.019607844, %v809_v46 }
 0x7c3   :  { %v811_v48 = vsub.f32 %v802_v43, %v810_v47  ;;  %v2771_v43 = vpack.c.bf16 %v973_v42, %v972_v38  ;;  %v1113_v38 = vld [vmem:[#allocation13 + $0x28] sm:$0xff]  ;;  %v1114_v42 = vld [vmem:[#allocation13 + $0x30] sm:$0xff] }
 0x7c4   :  { %v2798_v41 = vpack.c.bf16 %v1113_v38, %v1112_v37  ;;  %v2117_v38 = vld [vmem:[%s4124_s13] ss:$0 sm:$0xff] }
 0x7c5   :  { %v812_v49 = vsel %vm442_vm2, %v811_v48, 0.0  ;;  %2772 = vmatpush3.bf16.msra.mxu1 %v2771_v43  ;;  %v1115_v43 = vld [vmem:[#allocation13 + $0x38] sm:$0xff] }
 0x7c6   :  { %v813_v50 = vmul.f32 %v812_v49, %v812_v49  ;;  %2773 = vmatprep.subr.bf16.mxu1 %v3519_v0 }
 0x7c8   :  { %v814_v51 = vsel %vm443_vm1, %v813_v50, 0.0  ;;  %v975_v50 = vld [vmem:[#allocation11 + $0x28] sm:$0xff] }
 0x7c9   :  { %815 = vadd.xlane.f32.xlu0 %v814_v51 }
 0x856   :  { %v816_v14 = vpop.xlane.xlu0 %815 }
 0x857   :  { %v817_v16 = vmul.f32 0.019607844, %v816_v14 }
 0x859   :  { %v818_v18 = vadd.f32 1e-05, %v817_v16 }
 0x85b   :  { %3094 = vrsqrt.f32 %v818_v18  ;;  %v2111_v18 = vld [vmem:[%s4119_s28] ss:$0 sm:$0xff] }
 0x865   :  { %v3095_v19 = vpop.eup %3094 }
 0x866   :  { %v820_v21 = vmul.f32 %v3095_v19, %v812_v49  ;;  %v974_v49 = vld [vmem:[#allocation11 + $0x20] sm:$0xff]  ;;  %v993_v19 = vmul.f32 %v2111_v18, %v3919_v17 }
 0x867   :  { %v2774_v51 = vpack.c.bf16 %v975_v50, %v974_v49  ;;  %v1120_v50 = vld [vmem:[#allocation13 + $0x60] sm:$0xff] }
 0x868   :  { %v827_v23 = vmul.f32 %v2105_v20, %v820_v21  ;;  %v2112_v21 = vld [vmem:[%s4120_s0] ss:$0 sm:$0xff] }
 0x869   :  { %2775 = vmatpush3.bf16.msra.mxu1 %v2774_v51  ;;  %v1121_v51 = vld [vmem:[#allocation13 + $0x68] sm:$0xff] }
 0x86a   :  { %v834_v24 = vadd.f32 %v2106_v22, %v827_v23  ;;  %2776 = vmatprep.subr.bf16.mxu1 %v3519_v0  ;;  %v2810_v52 = vpack.c.bf16 %v1121_v51, %v1120_v50  ;;  %v1402_v50 = vld [vmem:[#allocation17 + $0x20] sm:$0xff] }
 0x86c   :  { %v2107_v25 = vmul.f32 -1.442695, %v834_v24 }
 0x86d   :  { %2778 = vmatpush3.bf16.msra.mxu1 %v2777_v54  ;;  %v1123_v54 = vld [vmem:[#allocation13 + $0x78] sm:$0xff] }
 0x86e   :  { %3096 = vpow2.f32 %v2107_v25  ;;  %2779 = vmatprep.subr.bf16.mxu1 %v3519_v0  ;;  %v2813_v55 = vpack.c.bf16 %v1123_v54, %v1122_v53  ;;  %v1400_v53 = vld [vmem:[#allocation17 + $0x10] sm:$0xff] }
 0x86f   :  { %v1404_v54 = vld [vmem:[#allocation17 + $0x30] sm:$0xff] }
 0x871   :  { %2781 = vmatpush3.bf16.msra.mxu1 %v2780_v57  ;;  %v1203_v57 = vld [vmem:[#allocation14 + $0x8] sm:$0xff] }
 0x872   :  { %2782 = vmatprep.subr.bf16.mxu1 %v3519_v0  ;;  %v2816_v59 = vpack.c.bf16 %v1203_v57, %v1202_v56  ;;  %v2873_v56 = vpack.c.bf16 %v1404_v54, %v1400_v53  ;;  %v1411_v57 = vld [vmem:[#allocation17 + $0x68] sm:$0xff]  ;;  %v1445_v54 = vld [vmem:[#allocation17 + $0x178] sm:$0xff] }
 0x875   :  { %2784 = vmatpush3.bf16.msra.mxu1 %v2783_v60  ;;  %v1205_v60 = vld [vmem:[#allocation14 + $0x18] sm:$0xff] }
 0x876   :  { %2785 = vmatprep.subr.bf16.mxu1 %v3519_v0  ;;  %v2819_v61 = vpack.c.bf16 %v1205_v60, %v1204_v58  ;;  %v1409_v58 = vld [vmem:[#allocation17 + $0x58] sm:$0xff] }
 0x878   :  { %v3097_v26 = vpop.eup %3096 }
 0x879   :  { %v838_v27 = vadd.f32 1.0, %v3097_v26  ;;  %2787 = vmatpush3.bf16.msra.mxu1 %v2786_v63  ;;  %v1207_v63 = vld [vmem:[#allocation14 + $0x28] sm:$0xff] }
 0x87a   :  { %2788 = vmatprep.subr.bf16.mxu1 %v3519_v0  ;;  %v2822_v2 = vpack.c.bf16 %v1207_v63, %v1206_v62  ;;  %v1406_v62 = vld [vmem:[#allocation17 + $0x40] sm:$0xff] }
 0x87b   :  { %3098 = vrcp.f32 %v838_v27  ;;  %v1410_v63 = vld [vmem:[#allocation17 + $0x60] sm:$0xff] }
 0x87d   :  { %2790 = vmatpush3.bf16.msra.mxu1 %v2789_v4  ;;  %v1209_v4 = vld [vmem:[#allocation14 + $0x38] sm:$0xff] }
 0x87e   :  { %2815 = vmatprep.subr.bf16.mxu1 %v3519_v0 }
 0x885   :  { %v3099_v29 = vpop.eup %3098 }
 0x886   :  { %v841_v30 = vmul.f32 %v3099_v29, %v3913_v15 }
 0x888   :  { %2470 = vmatmul.mubr.f32.vlgmr.msra.gmra.mrb[4].mxu0 %v841_v30 }
 0x889   :  { %2539 = vmatprep.mubr.msk.f32.mxu0 %vm3520_vm0, %v3521_v1 }
 0x95b   :  { %v931_v32 = vpop.f32.mrb[4].mxu0 }
 0x95c   :  { %v932_v33 = vadd.f32 %v2108_v31, %v931_v32  ;;  %v2471_v34 = vpop.f32.mrb[5].mxu0  ;;  %v1108_v32 = vld [vmem:[#allocation13] sm:$0xff] }
 0x95e   :  { %v935_v28 = vmul.f32 1.1, %v932_v33  ;;  %v1109_v33 = vld [vmem:[#allocation13 + $0x8] sm:$0xff] }
 0x95f   :  { %v2792_v34 = vpack.c.bf16 %v1109_v33, %v1108_v32  ;;  %v1216_v32 = vld [vmem:[#allocation14 + $0x70] sm:$0xff]  ;;  %v1217_v33 = vld [vmem:[#allocation14 + $0x78] sm:$0xff] }
 0x960   :  { %v939_v35 = vsel %vm443_vm1, %v935_v28, 0.0 }
 0x961   :  { %940 = vadd.xlane.f32.xlu0 %v939_v35  ;;  %2793 = vmatpush3.bf16.msra.mxu0 %v2792_v34  ;;  %v1111_v35 = vld [vmem:[#allocation13 + $0x18] sm:$0xff]  ;;  %v2837_v34 = vpack.c.bf16 %v1217_v33, %v1216_v32 }
 0x962   :  { %2794 = vmatprep.subr.bf16.mxu0 %v3519_v0 }
 0x9ee   :  { %v941_v15 = vpop.xlane.xlu0 %940 }
 0x9ef   :  { %v942_v44 = vmul.f32 0.015625, %v941_v15  ;;  %v2801_v15 = vpack.c.bf16 %v1115_v43, %v1114_v42 }
 0x9f1   :  { %v943_v45 = vsub.f32 %v935_v28, %v942_v44  ;;  %v1110_v28 = vld [vmem:[#allocation13 + $0x10] sm:$0xff]  ;;  %v1116_v44 = vld [vmem:[#allocation13 + $0x40] sm:$0xff] }
 0x9f2   :  { %v2795_v36 = vpack.c.bf16 %v1111_v35, %v1110_v28  ;;  %v2116_v28 = vld [vmem:[%s4123_s11] ss:$0 sm:$0xff] }
 0x9f3   :  { %v944_v46 = vsel %vm938_vm4, %v943_v45, 0.0  ;;  %v1117_v45 = vld [vmem:[#allocation13 + $0x48] sm:$0xff] }
 0x9f4   :  { %v945_v47 = vmul.f32 %v944_v46, %v944_v46  ;;  %2796 = vmatpush3.bf16.msra.mxu0 %v2795_v36 }
 0x9f5   :  { %2797 = vmatprep.subr.bf16.mxu0 %v3519_v0 }
 0x9f6   :  { %v946_v48 = vsel %vm443_vm1, %v945_v47, 0.0  ;;  %v1118_v47 = vld [vmem:[#allocation13 + $0x50] sm:$0xff] }
 0x9f7   :  { %947 = vadd.xlane.f32.xlu0 %v946_v48  ;;  %v1119_v48 = vld [vmem:[#allocation13 + $0x58] sm:$0xff] }
 0x9f8   :  { %2799 = vmatpush3.bf16.msra.mxu0 %v2798_v41  ;;  %v2807_v49 = vpack.c.bf16 %v1119_v48, %v1118_v47  ;;  %v1405_v48 = vld [vmem:[#allocation17 + $0x38] sm:$0xff] }
 0x9f9   :  { %2800 = vmatprep.subr.bf16.mxu0 %v3519_v0 }
 0x9fc   :  { %2802 = vmatpush3.bf16.msra.mxu0 %v2801_v15 }
 0x9fd   :  { %2803 = vmatprep.subr.bf16.mxu0 %v3519_v0 }
 0xa84   :  { %v948_v5 = vpop.xlane.xlu0 %947 }
 0xa85   :  { %v949_v6 = vmul.f32 0.015625, %v948_v5  ;;  %v2825_v5 = vpack.c.bf16 %v1209_v4, %v1208_v3  ;;  %v2845_v3 = vpack.c.bf16 %v1410_v63, %v1406_v62  ;;  %v1412_v4 = vld [vmem:[#allocation17 + $0x70] sm:$0xff]  ;;  %v1447_v62 = vld [vmem:[#allocation17 + $0x188] sm:$0xff] }
 0xa86   :  { %v1451_v63 = vld [vmem:[#allocation17 + $0x1a8] sm:$0xff] }
 0xa87   :  { %v950_v7 = vadd.f32 1e-05, %v949_v6  ;;  %v1210_v6 = vld [vmem:[#allocation14 + $0x40] sm:$0xff] }
 0xa89   :  { %3100 = vrsqrt.f32 %v950_v7  ;;  %v1211_v7 = vld [vmem:[#allocation14 + $0x48] sm:$0xff] }
 0xa93   :  { %v3101_v8 = vpop.eup %3100 }
 0xa94   :  { %v952_v10 = vmul.f32 %v3101_v8, %v944_v46  ;;  %v2804_v46 = vpack.c.bf16 %v1117_v45, %v1116_v44  ;;  %v2828_v8 = vpack.c.bf16 %v1211_v7, %v1210_v6  ;;  %v1399_v44 = vld [vmem:[#allocation17 + $0x8] sm:$0xff] }
 0xa95   :  { %v1403_v45 = vld [vmem:[#allocation17 + $0x28] sm:$0xff] }
 0xa96   :  { %v959_v12 = vmul.f32 %v2109_v9, %v952_v10  ;;  %2805 = vmatpush3.bf16.msra.mxu0 %v2804_v46  ;;  %v1212_v9 = vld [vmem:[#allocation14 + $0x50] sm:$0xff]  ;;  %v1213_v10 = vld [vmem:[#allocation14 + $0x58] sm:$0xff]  ;;  %v2839_v47 = vpack.c.bf16 %v1403_v45, %v1399_v44  ;;  %v1419_v6 = vld [vmem:[#allocation17 + $0xa8] sm:$0xff] }
 0xa97   :  { %2806 = vmatprep.subr.bf16.mxu0 %v3519_v0  ;;  %v1401_v46 = vld [vmem:[#allocation17 + $0x18] sm:$0xff]  ;;  %v1430_v45 = vld [vmem:[#allocation17 + $0x100] sm:$0xff] }
 0xa98   :  { %v966_v13 = vadd.f32 %v2110_v11, %v959_v12  ;;  %v2831_v11 = vpack.c.bf16 %v1213_v10, %v1212_v9  ;;  %v1214_v12 = vld [vmem:[#allocation14 + $0x60] sm:$0xff]  ;;  %v2871_v51 = vpack.c.bf16 %v1405_v48, %v1401_v46  ;;  %v1417_v9 = vld [vmem:[#allocation17 + $0x98] sm:$0xff] }
 0xa99   :  { %v1421_v10 = vld [vmem:[#allocation17 + $0xb8] sm:$0xff]  ;;  %v1434_v46 = vld [vmem:[#allocation17 + $0x120] sm:$0xff] }
 0xa9a   :  { %vm967_vm5 = vcmp.gt.f32.partialorder %v966_v13, 0.0  ;;  %v968_v14 = vmul.f32 0.1, %v966_v13  ;;  %2808 = vmatpush3.bf16.msra.mxu0 %v2807_v49  ;;  %v1398_v49 = vld [vmem:[#allocation17] sm:$0xff]  ;;  %v1437_v44 = vld [vmem:[#allocation17 + $0x138] sm:$0xff]  ;;  %v2857_v48 = vpack.c.bf16 %v1434_v46, %v1430_v45 }
 0xa9b   :  { %2809 = vmatprep.subr.bf16.mxu0 %v3519_v0  ;;  %v1349_v46 = vld [vmem:[#allocation16 + $0x78] sm:$0xff] }
 0xa9c   :  { %v3989_v16 = vsel %vm967_vm5, %v966_v13, %v968_v14  ;;  %v1215_v13 = vld [vmem:[#allocation14 + $0x68] sm:$0xff] }
 0xa9d   :  { %2505 = vmatmul.mubr.f32.vlgmr.msra.gmra.mrb[4].mxu1 %v3989_v16  ;;  %v2834_v14 = vpack.c.bf16 %v1215_v13, %v1214_v12  ;;  %v2879_v12 = vpack.c.bf16 %v1421_v10, %v1417_v9  ;;  %v1418_v13 = vld [vmem:[#allocation17 + $0xa0] sm:$0xff]  ;;  %v1448_v9 = vld [vmem:[#allocation17 + $0x190] sm:$0xff] }
 0xa9e   :  { %2574 = vmatprep.mubr.msk.f32.mxu1 %vm3520_vm0, %v3521_v1  ;;  %2811 = vmatpush3.bf16.msra.mxu0 %v2810_v52  ;;  %v2841_v52 = vpack.c.bf16 %v1402_v50, %v1398_v49  ;;  %v1436_v49 = vld [vmem:[#allocation17 + $0x130] sm:$0xff]  ;;  %v1439_v50 = vld [vmem:[#allocation17 + $0x148] sm:$0xff] }
 0xa9f   :  { %2812 = vmatprep.subr.bf16.mxu0 %v3519_v0  ;;  %2817 = vmatpush3.bf16.msra.mxu1 %v2816_v59  ;;  %v1413_v59 = vld [vmem:[#allocation17 + $0x78] sm:$0xff]  ;;  %v1452_v10 = vld [vmem:[#allocation17 + $0x1b0] sm:$0xff] }
 0xaa0   :  { %2818 = vmatprep.subr.bf16.mxu1 %v3519_v0 }
 0xaa2   :  { %2814 = vmatpush3.bf16.msra.mxu0 %v2813_v55  ;;  %v1407_v55 = vld [vmem:[#allocation17 + $0x48] sm:$0xff] }
 0xaa3   :  { %2820 = vmatpush3.bf16.msra.mxu1 %v2819_v61  ;;  %2840 = vmatprep.subr.bf16.mxu0 %v2839_v47  ;;  %v2843_v60 = vpack.c.bf16 %v1411_v57, %v1407_v55  ;;  %v2875_v61 = vpack.c.bf16 %v1413_v59, %v1409_v58  ;;  %v1438_v55 = vld [vmem:[#allocation17 + $0x140] sm:$0xff]  ;;  %v1440_v59 = vld [vmem:[#allocation17 + $0x150] sm:$0xff] }
 0xaa4   :  { %2821 = vmatprep.subr.bf16.mxu1 %v3519_v0 }
 0xaa7   :  { %2823 = vmatpush3.bf16.msra.mxu1 %v2822_v2  ;;  %v1408_v2 = vld [vmem:[#allocation17 + $0x50] sm:$0xff] }
 0xaa8   :  { %2824 = vmatprep.subr.bf16.mxu1 %v3519_v0  ;;  %v2877_v7 = vpack.c.bf16 %v1412_v4, %v1408_v2  ;;  %v1449_v2 = vld [vmem:[#allocation17 + $0x198] sm:$0xff] }
 0xaa9   :  { %v1453_v4 = vld [vmem:[#allocation17 + $0x1b8] sm:$0xff] }
 0xaab   :  { %2826 = vmatpush3.bf16.msra.mxu1 %v2825_v5  ;;  %v1415_v5 = vld [vmem:[#allocation17 + $0x88] sm:$0xff] }
 0xaac   :  { %2827 = vmatprep.subr.bf16.mxu1 %v3519_v0 }
 0xaaf   :  { %2829 = vmatpush3.bf16.msra.mxu1 %v2828_v8  ;;  %v2847_v8 = vpack.c.bf16 %v1419_v6, %v1415_v5  ;;  %v1446_v5 = vld [vmem:[#allocation17 + $0x180] sm:$0xff] }
 0xab0   :  { %2830 = vmatprep.subr.bf16.mxu1 %v3519_v0  ;;  %v1450_v6 = vld [vmem:[#allocation17 + $0x1a0] sm:$0xff] }
 0xab3   :  { %2832 = vmatpush3.bf16.msra.mxu1 %v2831_v11  ;;  %v1414_v11 = vld [vmem:[#allocation17 + $0x80] sm:$0xff] }
 0xab4   :  { %2833 = vmatprep.subr.bf16.mxu1 %v3519_v0 }
 0xab7   :  { %2835 = vmatpush3.bf16.msra.mxu1 %v2834_v14  ;;  %v1416_v14 = vld [vmem:[#allocation17 + $0x90] sm:$0xff] }
 0xab8   :  { %2836 = vmatprep.subr.bf16.mxu1 %v3519_v0 }
 0xabb   :  { %2838 = vmatpush3.bf16.msra.mxu1 %v2837_v34 }
 0xabc   :  { %2872 = vmatprep.subr.bf16.mxu1 %v2871_v51  ;;  %v1443_v51 = vld [vmem:[#allocation17 + $0x168] sm:$0xff] }
 0xabd   :  { %v2859_v53 = vpack.c.bf16 %v1443_v51, %v1439_v50  ;;  %v1348_v50 = vld [vmem:[#allocation16 + $0x70] sm:$0xff] }
 0xb70   :  { %v1060_v20 = vpop.f32.mrb[4].mxu1 }
 0xb71   :  { %v1061_v22 = vadd.f32 %v1060_v20, %v993_v19  ;;  %v2506_v23 = vpop.f32.mrb[5].mxu1 }
 0xb73   :  { %v1071_v24 = vadd.f32 %v2112_v21, %v1061_v22  ;;  %v2113_v22 = vld [vmem:[%s4121_s1] ss:$0 sm:$0xff] }
 0xb75   :  { %v1074_v25 = vsel %vm443_vm1, %v1071_v24, 0.0 }
 0xb76   :  { %1075 = vadd.xlane.f32.xlu0 %v1074_v25 }
 0xc03   :  { %v1076_v26 = vpop.xlane.xlu0 %1075 }
 0xc04   :  { %v1077_v27 = vmul.f32 0.015625, %v1076_v26 }
 0xc06   :  { %v1078_v29 = vsub.f32 %v1071_v24, %v1077_v27  ;;  %v2114_v24 = vld [vmem:[%s4122_s10] ss:$0 sm:$0xff] }
 0xc08   :  { %v4000_v30 = vsel %vm938_vm4, %v1078_v29, 0.0 }
 0xc09   :  { %v1080_v31 = vmul.f32 %v4000_v30, %v4000_v30 }
 0xc0b   :  { %v1081_v17 = vsel %vm443_vm1, %v1080_v31, 0.0 }
 0xc0c   :  { %1082 = vadd.xlane.f32.xlu0 %v1081_v17 }
 0xc99   :  { %v1083_v18 = vpop.xlane.xlu0 %1082 }
 0xc9a   :  { %v1084_v19 = vmul.f32 0.015625, %v1083_v18  ;;  %v1420_v18 = vld [vmem:[#allocation17 + $0xb0] sm:$0xff] }
 0xc9c   :  { %v1085_v20 = vadd.f32 1e-05, %v1084_v19  ;;  %v2849_v19 = vpack.c.bf16 %v1418_v13, %v1414_v11  ;;  %v2897_v11 = vpack.c.bf16 %v1452_v10, %v1448_v9  ;;  %v1459_v13 = vld [vmem:[#allocation17 + $0x1e8] sm:$0xff]  ;;  %v1362_v9 = vld [vmem:[#allocation16 + $0xe0] sm:$0xff]  ;;  %v1360_v10 = vld [vmem:[#allocation16 + $0xd0] sm:$0xff] }
 0xc9e   :  { %3102 = vrsqrt.f32 %v1085_v20  ;;  %v1423_v20 = vld [vmem:[#allocation17 + $0xc8] sm:$0xff] }
 0xca8   :  { %v3103_v21 = vpop.eup %3102 }
 0xca9   :  { %v1087_v23 = vmul.f32 %v3103_v21, %v4000_v30  ;;  %v1427_v21 = vld [vmem:[#allocation17 + $0xe8] sm:$0xff] }
 0xcab   :  { %v1094_v25 = vmul.f32 %v2113_v22, %v1087_v23  ;;  %v1425_v22 = vld [vmem:[#allocation17 + $0xd8] sm:$0xff]  ;;  %v2881_v23 = vpack.c.bf16 %v1420_v18, %v1416_v14 }
 0xcac   :  { %v1457_v14 = vld [vmem:[#allocation17 + $0x1d8] sm:$0xff] }
 0xcad   :  { %v1101_v26 = vadd.f32 %v2114_v24, %v1094_v25  ;;  %v2851_v24 = vpack.c.bf16 %v1427_v21, %v1423_v20  ;;  %v1429_v25 = vld [vmem:[#allocation17 + $0xf8] sm:$0xff]  ;;  %v1454_v20 = vld [vmem:[#allocation17 + $0x1c0] sm:$0xff] }
 0xcae   :  { %v1458_v21 = vld [vmem:[#allocation17 + $0x1e0] sm:$0xff] }
 0xcaf   :  { %v2115_v27 = vmul.f32 -1.442695, %v1101_v26  ;;  %v1422_v26 = vld [vmem:[#allocation17 + $0xc0] sm:$0xff] }
 0xcb1   :  { %3104 = vpow2.f32 %v2115_v27  ;;  %v1426_v27 = vld [vmem:[#allocation17 + $0xe0] sm:$0xff] }
 0xcb2   :  { %v2853_v32 = vpack.c.bf16 %v1426_v27, %v1422_v26  ;;  %v1335_v27 = vld [vmem:[#allocation16 + $0x8] sm:$0xff] }
 0xcbb   :  { %v3105_v29 = vpop.eup %3104 }
 0xcbc   :  { %v1105_v31 = vadd.f32 1.0, %v3105_v29  ;;  %v2883_v29 = vpack.c.bf16 %v1429_v25, %v1425_v22  ;;  %v1460_v25 = vld [vmem:[#allocation17 + $0x1f0] sm:$0xff] }
 0xcbe   :  { %3106 = vrcp.f32 %v1105_v31  ;;  %v1424_v31 = vld [vmem:[#allocation17 + $0xd0] sm:$0xff] }
 0xcc8   :  { %v3107_v17 = vpop.eup %3106 }
 0xcc9   :  { %2540 = vmatmul.mubr.f32.vlgmr.msra.gmra.mrb[6].mxu0 %v3107_v17  ;;  %v1428_v17 = vld [vmem:[#allocation17 + $0xf0] sm:$0xff] }
 0xcca   :  { %1526 = vmatprep.mubr.f32.mxu0 %v3521_v1  ;;  %2842 = vmatpush1.bf16.msra.mxu0 %v2841_v52  ;;  %v2885_v33 = vpack.c.bf16 %v1428_v17, %v1424_v31  ;;  %v1441_v52 = vld [vmem:[#allocation17 + $0x158] sm:$0xff] }
 0xccb   :  { %2844 = vmatprep.subr.bf16.mxu0 %v2843_v60  ;;  %v2891_v57 = vpack.c.bf16 %v1445_v54, %v1441_v52  ;;  %v1444_v60 = vld [vmem:[#allocation17 + $0x170] sm:$0xff]  ;;  %v1337_v31 = vld [vmem:[#allocation16 + $0x18] sm:$0xff]  ;;  %v1351_v52 = vld [vmem:[#allocation16 + $0x88] sm:$0xff] }
 0xccc   :  { %v1353_v54 = vld [vmem:[#allocation16 + $0x98] sm:$0xff] }
 0xcce   :  { %2846 = vmatpush1.bf16.msra.mxu0 %v2845_v3  ;;  %v2863_v3 = vpack.c.bf16 %v1451_v63, %v1447_v62  ;;  %v1356_v62 = vld [vmem:[#allocation16 + $0xb0] sm:$0xff]  ;;  %v1359_v63 = vld [vmem:[#allocation16 + $0xc8] sm:$0xff] }
 0xccf   :  { %2848 = vmatprep.subr.bf16.mxu0 %v2847_v8  ;;  %v2865_v8 = vpack.c.bf16 %v1450_v6, %v1446_v5  ;;  %v1365_v5 = vld [vmem:[#allocation16 + $0xf8] sm:$0xff] }
 0xcd2   :  { %2850 = vmatpush1.bf16.msra.mxu0 %v2849_v19  ;;  %v1461_v19 = vld [vmem:[#allocation17 + $0x1f8] sm:$0xff] }
 0xcd3   :  { %2852 = vmatprep.subr.bf16.mxu0 %v2851_v24  ;;  %v2899_v22 = vpack.c.bf16 %v1461_v19, %v1457_v14  ;;  %v1456_v24 = vld [vmem:[#allocation17 + $0x1d0] sm:$0xff]  ;;  %v1371_v14 = vld [vmem:[#allocation16 + $0x128] sm:$0xff] }
 0xcd4   :  { %v2901_v26 = vpack.c.bf16 %v1460_v25, %v1456_v24  ;;  %v1370_v24 = vld [vmem:[#allocation16 + $0x120] sm:$0xff]  ;;  %v1368_v25 = vld [vmem:[#allocation16 + $0x110] sm:$0xff] }
 0xcd6   :  { %2854 = vmatpush1.bf16.msra.mxu0 %v2853_v32  ;;  %v1341_v32 = vld [vmem:[#allocation16 + $0x38] sm:$0xff] }
 0xd9c   :  { %v1197_v30 = vpop.f32.mrb[6].mxu0 }
 0xd9d   :  { %v1198_v35 = vadd.f32 %v2116_v28, %v1197_v30  ;;  %v2541_v36 = vpop.f32.mrb[7].mxu0 }
 0xd9f   :  { %v1201_v37 = vmax.f32 %v1198_v35, 0.0 }
 0xda1   :  { %2575 = vmatmul.mubr.f32.vlgmr.msra.gmra.mrb[6].mxu1 %v1201_v37 }
 0xda2   :  { %1597 = vmatprep.mubr.f32.mxu1 %v3521_v1  ;;  %2874 = vmatpush1.bf16.msra.mxu1 %v2873_v56  ;;  %v1442_v56 = vld [vmem:[#allocation17 + $0x160] sm:$0xff] }
 0xda3   :  { %2876 = vmatprep.subr.bf16.mxu1 %v2875_v61  ;;  %v2861_v58 = vpack.c.bf16 %v1442_v56, %v1438_v55  ;;  %v2893_v61 = vpack.c.bf16 %v1444_v60, %v1440_v59  ;;  %v1357_v56 = vld [vmem:[#allocation16 + $0xb8] sm:$0xff] }
 0xda4   :  { %v2943_v59 = vpack.c.bf16 %v1357_v56, %v1353_v54  ;;  %v1397_v54 = vld [vmem:[#allocation16 + $0x1f8] sm:$0xff] }
 0xda6   :  { %2878 = vmatpush1.bf16.msra.mxu1 %v2877_v7  ;;  %v2895_v7 = vpack.c.bf16 %v1453_v4, %v1449_v2  ;;  %v1361_v4 = vld [vmem:[#allocation16 + $0xd8] sm:$0xff] }
 0xda7   :  { %2880 = vmatprep.subr.bf16.mxu1 %v2879_v12  ;;  %v1455_v12 = vld [vmem:[#allocation17 + $0x1c8] sm:$0xff] }
 0xda8   :  { %v2867_v18 = vpack.c.bf16 %v1459_v13, %v1455_v12  ;;  %v1364_v12 = vld [vmem:[#allocation16 + $0xf0] sm:$0xff]  ;;  %v1367_v13 = vld [vmem:[#allocation16 + $0x108] sm:$0xff] }
 0xda9   :  { %v2919_v19 = vpack.c.bf16 %v1371_v14, %v1367_v13 }
 0xdaa   :  { %2882 = vmatpush1.bf16.msra.mxu1 %v2881_v23  ;;  %v2869_v23 = vpack.c.bf16 %v1458_v21, %v1454_v20  ;;  %v1369_v20 = vld [vmem:[#allocation16 + $0x118] sm:$0xff] }
 0xdab   :  { %2884 = vmatprep.subr.bf16.mxu1 %v2883_v29  ;;  %v1339_v29 = vld [vmem:[#allocation16 + $0x28] sm:$0xff]  ;;  %v1373_v21 = vld [vmem:[#allocation16 + $0x138] sm:$0xff] }
 0xdac   :  { %v2903_v17 = vpack.c.bf16 %v1339_v29, %v1335_v27  ;;  %v1375_v27 = vld [vmem:[#allocation16 + $0x148] sm:$0xff] }
 0xdad   :  { %v1379_v29 = vld [vmem:[#allocation16 + $0x168] sm:$0xff] }
 0xdae   :  { %2886 = vmatpush1.bf16.msra.mxu1 %v2885_v33  ;;  %v1334_v33 = vld [vmem:[#allocation16] sm:$0xff] }
 0xe74   :  { %v1291_v41 = vpop.f32.mrb[6].mxu1 }
 0xe75   :  { %v4026_v42 = vadd.f32 %v2117_v38, %v1291_v41  ;;  %v2576_v43 = vpop.f32.mrb[7].mxu1  ;;  %v1431_v38 = vld [vmem:[#allocation17 + $0x108] sm:$0xff] }
 0xe76   :  { %v1435_v41 = vld [vmem:[#allocation17 + $0x128] sm:$0xff]  ;;  %v1433_v43 = vld [vmem:[#allocation17 + $0x118] sm:$0xff] }
 0xe77   :  { %v1297_v15 = vsel %vm443_vm1, %v4026_v42, 0.0  ;;  %v2887_v47 = vpack.c.bf16 %v1437_v44, %v1433_v43  ;;  %v1343_v43 = vld [vmem:[#allocation16 + $0x48] sm:$0xff]  ;;  %v1345_v44 = vld [vmem:[#allocation16 + $0x58] sm:$0xff] }
 0xe78   :  { %1298 = vadd.xlane.f32.xlu0 %v1297_v15  ;;  %v2855_v15 = vpack.c.bf16 %v1435_v41, %v1431_v38  ;;  %v1332_v38 = vld [vmem:[%s4125_s15] sm:$0x3] }
 0xe79   :  { %2888 = vmatprep.subr.bf16.mxu1 %v2887_v47  ;;  %v1342_v47 = vld [vmem:[#allocation16 + $0x40] sm:$0xff] }
 0xe7a   :  { %2856 = vmatprep.subr.bf16.mxu0 %v2855_v15  ;;  %v1347_v15 = vld [vmem:[#allocation16 + $0x68] sm:$0xff] }
 0xe7b   :  { %2858 = vmatpush1.bf16.msra.mxu0 %v2857_v48  ;;  %v2907_v45 = vpack.c.bf16 %v1347_v15, %v1343_v43  ;;  %v1346_v48 = vld [vmem:[#allocation16 + $0x60] sm:$0xff]  ;;  %v1387_v43 = vld [vmem:[#allocation16 + $0x1a8] sm:$0xff]  ;;  %v1385_v15 = vld [vmem:[#allocation16 + $0x198] sm:$0xff] }
 0xe7c   :  { %2860 = vmatprep.subr.bf16.mxu0 %v2859_v53  ;;  %v1355_v53 = vld [vmem:[#allocation16 + $0xa8] sm:$0xff] }
 0xe7d   :  { %v2911_v55 = vpack.c.bf16 %v1355_v53, %v1351_v52  ;;  %v1395_v52 = vld [vmem:[#allocation16 + $0x1e8] sm:$0xff]  ;;  %v1393_v53 = vld [vmem:[#allocation16 + $0x1d8] sm:$0xff] }
 0xe7f   :  { %2862 = vmatpush1.bf16.msra.mxu0 %v2861_v58  ;;  %v1354_v58 = vld [vmem:[#allocation16 + $0xa0] sm:$0xff] }
 0xe80   :  { %2864 = vmatprep.subr.bf16.mxu0 %v2863_v3  ;;  %v1363_v3 = vld [vmem:[#allocation16 + $0xe8] sm:$0xff] }
 0xe81   :  { %v2915_v6 = vpack.c.bf16 %v1363_v3, %v1359_v63 }
 0xe83   :  { %2866 = vmatpush1.bf16.msra.mxu0 %v2865_v8  ;;  %v1358_v8 = vld [vmem:[#allocation16 + $0xc0] sm:$0xff] }
 0xe84   :  { %2868 = vmatprep.subr.bf16.mxu0 %v2867_v18  ;;  %v2949_v18 = vpack.c.bf16 %v1364_v12, %v1360_v10 }
 0xe87   :  { %2870 = vmatpush1.bf16.msra.mxu0 %v2869_v23  ;;  %v2951_v23 = vpack.c.bf16 %v1373_v21, %v1369_v20  ;;  %v1823_v20 = vld [vmem:[#allocation19 + $0x8] sm:$0xff] }
 0xe88   :  { %2904 = vmatprep.subr.bf16.mxu0 %v2903_v17 }
 0xe8a   :  { %1527 = vmatmul.mubr.f32.vlgmr.msra.gmra.mrb[8].mxu0 %v1332_v38 }
 0xe8b   :  { %1668 = vmatprep.mubr.f32.mxu0 %v3521_v1 }
 0xf05   :  { %v1299_v34 = vpop.xlane.xlu0 %1298 }
 0xf06   :  { %v1300_v28 = vmul.f32 0.015625, %v1299_v34  ;;  %v1338_v34 = vld [vmem:[#allocation16 + $0x20] sm:$0xff] }
 0xf08   :  { %v1301_v30 = vsub.f32 %v4026_v42, %v1300_v28  ;;  %v1432_v42 = vld [vmem:[#allocation17 + $0x110] sm:$0xff]  ;;  %v2935_v28 = vpack.c.bf16 %v1341_v32, %v1337_v31  ;;  %v1377_v31 = vld [vmem:[#allocation16 + $0x158] sm:$0xff] }
 0xf09   :  { %v2889_v40 = vpack.c.bf16 %v1436_v49, %v1432_v42  ;;  %v2939_v42 = vpack.c.bf16 %v1349_v46, %v1345_v44  ;;  %v2909_v49 = vpack.c.bf16 %v1346_v48, %v1342_v47  ;;  %v1381_v32 = vld [vmem:[#allocation16 + $0x178] sm:$0xff]  ;;  %v1382_v48 = vld [vmem:[#allocation16 + $0x180] sm:$0xff] }
 0xf0a   :  { %v4033_v35 = vsel %vm938_vm4, %v1301_v30, 0.0  ;;  %v2905_v30 = vpack.c.bf16 %v1338_v34, %v1334_v33  ;;  %v2923_v34 = vpack.c.bf16 %v1379_v29, %v1375_v27  ;;  %v1389_v44 = vld [vmem:[#allocation16 + $0x1b8] sm:$0xff]  ;;  %v1828_v27 = vld [vmem:[#allocation19 + $0x30] sm:$0xff] }
 0xf0b   :  { %v1303_v36 = vmul.f32 %v4033_v35, %v4033_v35  ;;  %2890 = vmatpush1.bf16.msra.mxu1 %v2889_v40  ;;  %v1344_v40 = vld [vmem:[#allocation16 + $0x50] sm:$0xff] }
 0xf0c   :  { %2892 = vmatprep.subr.bf16.mxu1 %v2891_v57  ;;  %2906 = vmatpush1.bf16.msra.mxu0 %v2905_v30  ;;  %v2941_v51 = vpack.c.bf16 %v1348_v50, %v1344_v40  ;;  %v1350_v57 = vld [vmem:[#allocation16 + $0x80] sm:$0xff]  ;;  %v2959_v40 = vpack.c.bf16 %v1389_v44, %v1385_v15  ;;  %v1388_v50 = vld [vmem:[#allocation16 + $0x1b0] sm:$0xff]  ;;  %v1749_v15 = vshrl.u32 %v440_v39, 7 }
 0xf0d   :  { %v1304_v37 = vsel %vm443_vm1, %v1303_v36, 0.0  ;;  %v1336_v36 = vld [vmem:[#allocation16 + $0x10] sm:$0xff]  ;;  %2908 = vmatprep.subr.bf16.mxu0 %v2907_v45  ;;  %v2913_v60 = vpack.c.bf16 %v1354_v58, %v1350_v57  ;;  %v1378_v30 = vld [vmem:[#allocation16 + $0x160] sm:$0xff] }
 0xf0e   :  { %1305 = vadd.xlane.f32.xlu0 %v1304_v37  ;;  %v1340_v37 = vld [vmem:[#allocation16 + $0x30] sm:$0xff]  ;;  %v1390_v58 = vld [vmem:[#allocation16 + $0x1c0] sm:$0xff]  ;;  %v1750_v44 = vsub.s32 0, %v1749_v15 }
 0xf0f   :  { %2894 = vmatpush1.bf16.msra.mxu1 %v2893_v61  ;;  %v2937_v41 = vpack.c.bf16 %v1340_v37, %v1336_v36  ;;  %v1352_v61 = vld [vmem:[#allocation16 + $0x90] sm:$0xff]  ;;  %v2955_v37 = vpack.c.bf16 %v1381_v32, %v1377_v31  ;;  %v1830_v31 = vld [vmem:[#allocation19 + $0x40] sm:$0xff] }
 0xf10   :  { %2896 = vmatprep.subr.bf16.mxu1 %v2895_v7  ;;  %2910 = vmatpush1.bf16.msra.mxu0 %v2909_v49  ;;  %v2945_v2 = vpack.c.bf16 %v1356_v62, %v1352_v61  ;;  %v2947_v7 = vpack.c.bf16 %v1365_v5, %v1361_v4  ;;  %v1376_v36 = vld [vmem:[#allocation16 + $0x150] sm:$0xff] }
 0xf11   :  { %2912 = vmatprep.subr.bf16.mxu0 %v2911_v55  ;;  %v1384_v49 = vld [vmem:[#allocation16 + $0x190] sm:$0xff] }
 0xf12   :  { %v2961_v56 = vpack.c.bf16 %v1388_v50, %v1384_v49  ;;  %v1392_v61 = vld [vmem:[#allocation16 + $0x1d0] sm:$0xff] }
 0xf13   :  { %2898 = vmatpush1.bf16.msra.mxu1 %v2897_v11  ;;  %v2917_v11 = vpack.c.bf16 %v1362_v9, %v1358_v8  ;;  %v1396_v62 = vld [vmem:[#allocation16 + $0x1f0] sm:$0xff]  ;;  %v2119_v9 = vld [vmem:[%s4127_s16] ss:$0 sm:$0xff] }
 0xf14   :  { %2900 = vmatprep.subr.bf16.mxu1 %v2899_v22  ;;  %2914 = vmatpush1.bf16.msra.mxu0 %v2913_v60  ;;  %v1366_v22 = vld [vmem:[#allocation16 + $0x100] sm:$0xff]  ;;  %v2963_v60 = vpack.c.bf16 %v1397_v54, %v1393_v53  ;;  %v1832_v32 = vld [vmem:[#allocation19 + $0x50] sm:$0xff] }
 0xf15   :  { %2916 = vmatprep.subr.bf16.mxu0 %v2915_v6  ;;  %v2921_v17 = vpack.c.bf16 %v1370_v24, %v1366_v22  ;;  %v1824_v22 = vld [vmem:[#allocation19 + $0x10] sm:$0xff] }
 0xf17   :  { %2902 = vmatpush1.bf16.msra.mxu1 %v2901_v26  ;;  %v1372_v26 = vld [vmem:[#allocation16 + $0x130] sm:$0xff] }
 0xf18   :  { %2936 = vmatprep.subr.bf16.mxu1 %v2935_v28  ;;  %2918 = vmatpush1.bf16.msra.mxu0 %v2917_v11  ;;  %v2953_v33 = vpack.c.bf16 %v1372_v26, %v1368_v25  ;;  %v1374_v28 = vld [vmem:[#allocation16 + $0x140] sm:$0xff]  ;;  %v1827_v25 = vld [vmem:[#allocation19 + $0x28] sm:$0xff] }
 0xf19   :  { %2920 = vmatprep.subr.bf16.mxu0 %v2919_v19  ;;  %v2925_v45 = vpack.c.bf16 %v1378_v30, %v1374_v28  ;;  %v1834_v30 = vld [vmem:[#allocation19 + $0x60] sm:$0xff] }
 0xf1a   :  { %1598 = vmatmul.mubr.f32.vlgmr.msra.gmra.mrb[8].mxu1 %v1332_v38  ;;  %v1380_v38 = vld [vmem:[#allocation16 + $0x170] sm:$0xff] }
 0xf1b   :  { %2938 = vmatpush1.bf16.msra.mxu1 %v2937_v41  ;;  %1739 = vmatprep.mubr.f32.mxu1 %v3521_v1  ;;  %v1383_v41 = vld [vmem:[#allocation16 + $0x188] sm:$0xff]  ;;  %v2957_v46 = vpack.c.bf16 %v1380_v38, %v1376_v36  ;;  %v1836_v38 = vld [vmem:[#allocation19 + $0x70] sm:$0xff] }
 0xf1c   :  { %2940 = vmatprep.subr.bf16.mxu1 %v2939_v42  ;;  %2922 = vmatpush1.bf16.msra.mxu0 %v2921_v17  ;;  %v2927_v47 = vpack.c.bf16 %v1387_v43, %v1383_v41  ;;  %v1386_v42 = vld [vmem:[#allocation16 + $0x1a0] sm:$0xff]  ;;  %v1831_v17 = vld [vmem:[#allocation19 + $0x48] sm:$0xff]  ;;  %v1837_v41 = vld [vmem:[#allocation19 + $0x78] sm:$0xff] }
 0xf1d   :  { %2924 = vmatprep.subr.bf16.mxu0 %v2923_v34  ;;  %v2929_v55 = vpack.c.bf16 %v1386_v42, %v1382_v48  ;;  %v1833_v34 = vld [vmem:[#allocation19 + $0x58] sm:$0xff]  ;;  %v1835_v36 = vld [vmem:[#allocation19 + $0x68] sm:$0xff]  ;;  %v2989_v43 = vpack.c.bf16 %v1837_v41, %v1836_v38  ;;  %v1762_v48 = vsub.s32 3, %v1749_v15  ;;  %v1772_v42 = vld [vmem:[%s4129_s18] sm:$0xf] }
 0xf1e   :  { %v2983_v28 = vpack.c.bf16 %v1833_v34, %v1832_v32  ;;  %v1927_v32 = vld [vmem:[#allocation20 + $0x28] sm:$0xff]  ;;  %v1928_v34 = vld [vmem:[#allocation20 + $0x30] sm:$0xff] }
 0xf1f   :  { %2942 = vmatpush1.bf16.msra.mxu1 %v2941_v51  ;;  %v1391_v51 = vld [vmem:[#allocation16 + $0x1c8] sm:$0xff]  ;;  %v1932_v41 = vld [vmem:[#allocation20 + $0x50] sm:$0xff] }
 0xf20   :  { %2944 = vmatprep.subr.bf16.mxu1 %v2943_v59  ;;  %2926 = vmatpush1.bf16.msra.mxu0 %v2925_v45  ;;  %v2931_v57 = vpack.c.bf16 %v1395_v52, %v1391_v51  ;;  %v1394_v59 = vld [vmem:[#allocation16 + $0x1e0] sm:$0xff]  ;;  %v1758_v45 = vsub.s32 2, %v1749_v15  ;;  %v1777_v52 = vrot.slane %v1772_v42, %v1750_v44 }
 0xf21   :  { %2928 = vmatprep.subr.bf16.mxu0 %v2927_v47  ;;  %v2933_v63 = vpack.c.bf16 %v1394_v59, %v1390_v58  ;;  %v1754_v47 = vsub.s32 1, %v1749_v15  ;;  %v1934_v15 = vld [vmem:[#allocation20 + $0x60] sm:$0xff] }
 0xf22   :  { %v1785_v53 = vrot.slane %v1772_v42, %v1758_v45 }
 0xf23   :  { %2946 = vmatpush1.bf16.msra.mxu1 %v2945_v2  ;;  %v2965_v2 = vpack.c.bf16 %v1396_v62, %v1392_v61 }
 0xf24   :  { %2948 = vmatprep.subr.bf16.mxu1 %v2947_v7  ;;  %2930 = vmatpush1.bf16.msra.mxu0 %v2929_v55  ;;  %v2118_v7 = vld [vmem:[%s4126_s27] ss:$0 sm:$0xff] }
 0xf25   :  { %2932 = vmatprep.subr.bf16.mxu0 %v2931_v57  ;;  %v1789_v57 = vrot.slane %v1772_v42, %v1762_v48 }
 0xf27   :  { %2950 = vmatpush1.bf16.msra.mxu1 %v2949_v18 }
 0xf28   :  { %2952 = vmatprep.subr.bf16.mxu1 %v2951_v23  ;;  %2934 = vmatpush1.bf16.msra.mxu0 %v2933_v63  ;;  %v1825_v23 = vld [vmem:[#allocation19 + $0x18] sm:$0xff] }
 0xf29   :  { %2967 = vmatprep.subr.bf16.mxu0 %v3519_v0  ;;  %v2971_v24 = vpack.c.bf16 %v1825_v23, %v1824_v22 }
 0xf2b   :  { %2954 = vmatpush1.bf16.msra.mxu1 %v2953_v33  ;;  %v2980_v33 = vpack.c.bf16 %v1831_v17, %v1830_v31  ;;  %v1926_v17 = vld [vmem:[#allocation20 + $0x20] sm:$0xff] }
 0xf2c   :  { %2956 = vmatprep.subr.bf16.mxu1 %v2955_v37  ;;  %v2986_v37 = vpack.c.bf16 %v1835_v36, %v1834_v30  ;;  %v1930_v36 = vld [vmem:[#allocation20 + $0x40] sm:$0xff] }
 0xf2f   :  { %2958 = vmatpush1.bf16.msra.mxu1 %v2957_v46  ;;  %v1746_v46 = vld [vmem:[%s4128_s30] sm:$0xf] }
 0xf30   :  { %2960 = vmatprep.subr.bf16.mxu1 %v2959_v40  ;;  %v1751_v49 = vrot.slane %v1746_v46, %v1750_v44  ;;  %v1759_v40 = vrot.slane %v1746_v46, %v1758_v45  ;;  %v1755_v50 = vrot.slane %v1746_v46, %v1754_v47  ;;  %v1763_v51 = vrot.slane %v1746_v46, %v1762_v48  ;;  %v1935_v45 = vld [vmem:[#allocation20 + $0x68] sm:$0xff]  ;;  %v1937_v48 = vld [vmem:[#allocation20 + $0x78] sm:$0xff] }
 0xf31   :  { %v3010_v46 = vpack.c.bf16 %v1935_v45, %v1934_v15 }
 0xf33   :  { %2962 = vmatpush1.bf16.msra.mxu1 %v2961_v56  ;;  %v1781_v56 = vrot.slane %v1772_v42, %v1754_v47  ;;  %v1936_v47 = vld [vmem:[#allocation20 + $0x70] sm:$0xff] }
 0xf34   :  { %2964 = vmatprep.subr.bf16.mxu1 %v2963_v60  ;;  %v3013_v42 = vpack.c.bf16 %v1937_v48, %v1936_v47 }
 0xf37   :  { %2966 = vmatpush1.bf16.msra.mxu1 %v2965_v2 }
 0xf38   :  { %2991 = vmatprep.subr.bf16.mxu1 %v3519_v0 }
 0xf9b   :  { %v1306_v3 = vpop.xlane.xlu0 %1305 }
 0xf9c   :  { %v1307_v4 = vmul.f32 0.015625, %v1306_v3 }
 0xf9e   :  { %v1308_v5 = vadd.f32 1e-05, %v1307_v4 }
 0xfa0   :  { %3108 = vrsqrt.f32 %v1308_v5 }
 0xfaa   :  { %v3109_v6 = vpop.eup %3108 }
 0xfab   :  { %v1310_v8 = vmul.f32 %v3109_v6, %v4033_v35  ;;  %v1822_v35 = vld [vmem:[#allocation19] sm:$0xff] }
 0xfac   :  { %v2968_v21 = vpack.c.bf16 %v1823_v20, %v1822_v35 }
 0xfad   :  { %v1317_v10 = vmul.f32 %v2118_v7, %v1310_v8 }
 0xfaf   :  { %v1324_v11 = vadd.f32 %v2119_v9, %v1317_v10 }
 0xfb1   :  { %v2120_v12 = vmul.f32 -1.442695, %v1324_v11 }
 0xfb3   :  { %3110 = vpow2.f32 %v2120_v12 }
 0xfbd   :  { %v3111_v13 = vpop.eup %3110 }
 0xfbe   :  { %v1328_v14 = vadd.f32 1.0, %v3111_v13 }
 0xfc0   :  { %3112 = vrcp.f32 %v1328_v14  ;;  %v1333_v14 = vld [vmem:[%s4130_s22] sm:$0x3] }
 0xfca   :  { %v3113_v18 = vpop.eup %3112 }
 0xfcb   :  { %v1331_v19 = vmul.f32 %v3113_v18, %v3989_v16  ;;  %2016 = vst [vmem:[#allocation23] sm:$0x3] %v3113_v18  ;;  %v1826_v16 = vld [vmem:[#allocation19 + $0x20] sm:$0xff] }
 0xfcc   :  { %v2974_v26 = vpack.c.bf16 %v1827_v25, %v1826_v16  ;;  %v1922_v25 = vld [vmem:[#allocation20] sm:$0xff] }
 0xfcd   :  { %1669 = vmatmul.mubr.f32.vlgmr.msra.gmra.mrb[8].mxu0 %v1331_v19  ;;  %1740 = vmatmul.mubr.f32.vlgmr.msra.gmra.mrb[8].mxu1 %v1331_v19 }
 0xfce   :  { %2609 = vmatprep.mubr.msk.f32.mxu0 %vm3520_vm0, %v3521_v1  ;;  %2644 = vmatprep.mubr.msk.f32.mxu1 %vm3520_vm0, %v3521_v1  ;;  %v1829_v1 = vld [vmem:[#allocation19 + $0x38] sm:$0xff] }
 0xfcf   :  { %2969 = vmatpush3.bf16.msra.mxu0 %v2968_v21  ;;  %v2977_v29 = vpack.c.bf16 %v1829_v1, %v1828_v27  ;;  %v1924_v1 = vld [vmem:[#allocation20 + $0x10] sm:$0xff] }
 0xfd0   :  { %2970 = vmatprep.subr.bf16.mxu0 %v3519_v0 }
 0xfd3   :  { %2972 = vmatpush3.bf16.msra.mxu0 %v2971_v24 }
 0xfd4   :  { %2973 = vmatprep.subr.bf16.mxu0 %v3519_v0 }
 0xfd7   :  { %2975 = vmatpush3.bf16.msra.mxu0 %v2974_v26  ;;  %v1923_v26 = vld [vmem:[#allocation20 + $0x8] sm:$0xff] }
 0xfd8   :  { %2976 = vmatprep.subr.bf16.mxu0 %v3519_v0  ;;  %v2992_v27 = vpack.c.bf16 %v1923_v26, %v1922_v25 }
 0xfda   :  { %2993 = vmatpush3.bf16.msra.mxu1 %v2992_v27 }
 0xfdb   :  { %2978 = vmatpush3.bf16.msra.mxu0 %v2977_v29  ;;  %2994 = vmatprep.subr.bf16.mxu1 %v3519_v0  ;;  %v1925_v29 = vld [vmem:[#allocation20 + $0x18] sm:$0xff] }
 0xfdc   :  { %2979 = vmatprep.subr.bf16.mxu0 %v3519_v0  ;;  %v2995_v31 = vpack.c.bf16 %v1925_v29, %v1924_v1 }
 0xfde   :  { %2996 = vmatpush3.bf16.msra.mxu1 %v2995_v31 }
 0xfdf   :  { %2981 = vmatpush3.bf16.msra.mxu0 %v2980_v33  ;;  %2997 = vmatprep.subr.bf16.mxu1 %v3519_v0  ;;  %v2998_v33 = vpack.c.bf16 %v1927_v32, %v1926_v17 }
 0xfe0   :  { %2982 = vmatprep.subr.bf16.mxu0 %v3519_v0 }
 0xfe2   :  { %2999 = vmatpush3.bf16.msra.mxu1 %v2998_v33 }
 0xfe3   :  { %2984 = vmatpush3.bf16.msra.mxu0 %v2983_v28  ;;  %3000 = vmatprep.subr.bf16.mxu1 %v3519_v0  ;;  %v1929_v28 = vld [vmem:[#allocation20 + $0x38] sm:$0xff] }
 0xfe4   :  { %2985 = vmatprep.subr.bf16.mxu0 %v3519_v0  ;;  %v3001_v30 = vpack.c.bf16 %v1929_v28, %v1928_v34 }
 0xfe6   :  { %3002 = vmatpush3.bf16.msra.mxu1 %v3001_v30 }
 0xfe7   :  { %2987 = vmatpush3.bf16.msra.mxu0 %v2986_v37  ;;  %3003 = vmatprep.subr.bf16.mxu1 %v3519_v0  ;;  %v1931_v37 = vld [vmem:[#allocation20 + $0x48] sm:$0xff] }
 0xfe8   :  { %2988 = vmatprep.subr.bf16.mxu0 %v3519_v0  ;;  %v3004_v38 = vpack.c.bf16 %v1931_v37, %v1930_v36 }
 0xfea   :  { %3005 = vmatpush3.bf16.msra.mxu1 %v3004_v38 }
 0xfeb   :  { %2990 = vmatpush3.bf16.msra.mxu0 %v2989_v43  ;;  %3006 = vmatprep.subr.bf16.mxu1 %v3519_v0  ;;  %v1933_v43 = vld [vmem:[#allocation20 + $0x58] sm:$0xff] }
 0xfec   :  { %v3007_v44 = vpack.c.bf16 %v1933_v43, %v1932_v41 }
 0xfee   :  { %3008 = vmatpush3.bf16.msra.mxu1 %v3007_v44 }
 0xfef   :  { %3009 = vmatprep.subr.bf16.mxu1 %v3519_v0 }
 0xff2   :  { %3011 = vmatpush3.bf16.msra.mxu1 %v3010_v46 }
 0xff3   :  { %3012 = vmatprep.subr.bf16.mxu1 %v3519_v0 }
 0xff6   :  { %3014 = vmatpush3.bf16.msra.mxu1 %v3013_v42 }
0x10a0   :  { %v1670_v54 = vpop.f32.mrb[8].mxu0  ;;  %v1741_v55 = vpop.f32.mrb[8].mxu1 }
0x10a1   :  { %v1768_v58 = vadd.f32 %v1751_v49, %v1670_v54  ;;  %v1770_v59 = vadd.f32 %v1759_v40, %v1741_v55  ;;  %v1672_v60 = vpop.f32.mrb[9].mxu0  ;;  %v1743_v39 = vpop.f32.mrb[9].mxu1  ;;  %v2124_v49 = vld [vmem:[%s4131_s23] ss:$0 sm:$0xff] }
0x10a2   :  { %v1769_v61 = vadd.f32 %v1755_v50, %v1672_v60  ;;  %v1771_v62 = vadd.f32 %v1763_v51, %v1743_v39 }
0x10a3   :  { %v1794_v63 = vadd.f32 %v1777_v52, %v1768_v58  ;;  %v1796_v2 = vadd.f32 %v1785_v53, %v1770_v59 }
0x10a4   :  { %v1795_v3 = vadd.f32 %v1781_v56, %v1769_v61  ;;  %v1797_v4 = vadd.f32 %v1789_v57, %v1771_v62 }
0x10a5   :  { %v2121_v5 = vmul.f32 -1.442695, %v1794_v63 }
0x10a6   :  { %v2122_v6 = vmul.f32 -1.442695, %v1795_v3  ;;  %v2123_v7 = vmul.f32 -1.442695, %v1797_v4 }
0x10a7   :  { %3114 = vpow2.f32 %v2121_v5 }
0x10a8   :  { %3116 = vpow2.f32 %v2122_v6 }
0x10a9   :  { %3118 = vpow2.f32 %v2123_v7 }
0x10aa   :  { %3120 = vtanh.f32 %v1796_v2 }
0x10b1   :  { %v3115_v8 = vpop.eup %3114 }
0x10b2   :  { %v3117_v9 = vpop.eup %3116  ;;  %v1804_v10 = vadd.f32 1.0, %v3115_v8 }
0x10b3   :  { %v1805_v11 = vadd.f32 1.0, %v3117_v9  ;;  %v3119_v12 = vpop.eup %3118 }
0x10b4   :  { %3122 = vrcp.f32 %v1804_v10  ;;  %v3121_v13 = vpop.eup %3120  ;;  %v1814_v20 = vadd.f32 1.0, %v3119_v12 }
0x10b5   :  { %3124 = vrcp.f32 %v1805_v11 }
0x10b6   :  { %3126 = vrcp.f32 %v1814_v20 }
0x10be   :  { %v3123_v18 = vpop.eup %3122 }
0x10bf   :  { %v3125_v19 = vpop.eup %3124  ;;  %v1818_v35 = vmul.f32 %v3123_v18, %v3121_v13 }
0x10c0   :  { %v1817_v21 = vmul.f32 %v3125_v19, %v1333_v14  ;;  %v3127_v23 = vpop.eup %3126 }
0x10c2   :  { %v1819_v22 = vadd.f32 %v1818_v35, %v1817_v21 }
0x10c4   :  { %3128 = vtanh.f32 %v1819_v22 }
0x10ce   :  { %v3129_v24 = vpop.eup %3128 }
0x10cf   :  { %v1821_v16 = vmul.f32 %v3129_v24, %v3127_v23 }
0x10d1   :  { %2610 = vmatmul.mubr.f32.vlgmr.msra.gmra.mrb[10].mxu0 %v1821_v16 }
0x11a4   :  { %v1911_v40 = vpop.f32.mrb[10].mxu0 }
0x11a5   :  { %v1912_v50 = vadd.f32 %v2124_v49, %v1911_v40  ;;  %v2611_v51 = vpop.f32.mrb[11].mxu0 }
0x11a7   :  { %v2125_v52 = vmul.f32 -1.442695, %v1912_v50 }
0x11a9   :  { %3130 = vpow2.f32 %v2125_v52 }
0x11b3   :  { %v3131_v53 = vpop.eup %3130 }
0x11b4   :  { %v1918_v54 = vadd.f32 1.0, %v3131_v53 }
0x11b6   :  { %3132 = vrcp.f32 %v1918_v54 }
0x11c0   :  { %v3133_v55 = vpop.eup %3132 }
0x11c1   :  { %v1921_v56 = vmul.f32 %v3133_v55, %v1821_v16 }
0x11c3   :  { %2645 = vmatmul.mubr.f32.vlgmr.msra.gmra.mrb[10].mxu1 %v1921_v56 }
0x11c4   :  { %3409 = shalt.err (!%p3406_p2)
}
0x11c5   :  { %s3410_s25 = scalar_lea.hbm %s3748_s3, 32 }
0x11c6   :  { %p3411_p3 = scmp.ne.s32.totalorder %s3748_s3, %s3410_s25  ;;  %p3414_p4 = scmp.lt.u32.totalorder %s3410_s25, %s3748_s3 }
0x11c8   :  { %p3416_p5 = pnand %p3414_p4, %p3411_p3 }
0x11ca   :  { %3419 = shalt.err (!%p3416_p5)
}
0x11cb   :  { %2036 = dma.vmem_to_hbm [thread:$0]  %s2034_s17, 32, %s3748_s3, [#allocation24]   ;;  %v2126_v0 = vld [vmem:[%s3738_s4] ss:$0 sm:$0xff] }
0x11cc   :  { %s3524_s14 = smov [#allocation22]  }
0x11cd   :  { %s2023_s24 = sshll.u32 %s3524_s14, 4  ;;  %s2024_s24 = int_to_ptr.vmem [resolvable:$true] %s2023_s24 }
0x11ce   :  { %s3420_s9 = scalar_lea.vmem %s2024_s24, 32  ;;  %p3425_p7 = scmp.lt.s32.totalorder %s2024_s24, %s2024_s24 }
0x11cf   :  { %p3421_p6 = scmp.ne.s32.totalorder %s2024_s24, %s3420_s9  ;;  %p3426_p8 = scmp.lt.s32.totalorder %s3420_s9, %s3420_s9 }
0x11d1   :  { %p3427_p9 = por %p3426_p8, %p3425_p7 }
0x11d3   :  { %p3428_p10 = pnand %p3427_p9, %p3421_p6 }
0x1296   :  { %v2011_v57 = vpop.f32.mrb[10].mxu1 }
0x1297   :  { %v2012_v58 = vadd.f32 %v2126_v0, %v2011_v57  ;;  %v2646_v59 = vpop.f32.mrb[11].mxu1 }
0x1299   :  { %2015 = vst [vmem:[#allocation22] sm:$0x3] %v2012_v58 }
0x129a   :  { %3431 = shalt.err (!%p3428_p10)
}
0x129b   :  { %s3432_s2 = scalar_lea.hbm %s3743_s29, 32 }
0x129c   :  { %p3433_p11 = scmp.ne.s32.totalorder %s3743_s29, %s3432_s2  ;;  %p3436_p12 = scmp.lt.u32.totalorder %s3432_s2, %s3743_s29 }
0x129e   :  { %p3438_p13 = pnand %p3436_p12, %p3433_p11 }
0x12a0   :  { %3441 = shalt.err (!%p3438_p13)
}
0x12a1   :  { %2026 = dma.vmem_to_hbm [thread:$0]  %s2024_s24, 32, %s3743_s29, [#allocation4]  }
0x12a2   :  { %3456 = dma.done.wait [#allocation4], 32  }
0x12a3   :  { %3457 = vsyncadd [#allocation4], 4294967264 }
0x12a4   :  { %3458 = dma.done.wait [#allocation24], 32  }
0x12a5   :  { %3459 = vsyncadd [#allocation24], 4294967264 }
0x12a6   :  { %2043 = vsyncpa [#allocation3], 1 }
0x12a7   :  { %2044 = vsyncpa [#allocation6], 1 }
0x12a8   :  { %2045 = vsyncpa [#allocation9], 1 }
0x12a9   :  { %2046 = vsyncpa [#allocation12], 1 }
0x12aa   :  { %2047 = vsyncpa [#allocation15], 1 }
0x12ab   :  { %2048 = vsyncpa [#allocation18], 1 }
0x12ac   :  { %2049 = vsyncpa [#allocation21], 1 }
0x12ad   :  { %2050 = vsyncpa [#allocation4], 1 }
0x12ae   :  { %2051 = vsyncpa [#allocation24], 1 }

</bundles_post_ra>
